<compile_context>
chip_gen: v7x
topology: tpu7x:2x2x1
jax: 0.10.0
libtpu: 0.0.40
codegen_flags: <defaults>
</compile_context>

<pallas_src>
import functools

import jax
import jax.numpy as jnp
from jax.experimental import pallas as pl
from jax.experimental.pallas import tpu as pltpu

_LANE = 128


def _round_up(n, m):
    return ((n + m - 1) // m) * m


def _fused_rnn_kernel(x_ref, w_ih_ref, w_hh_ref, b_rnn_ref, w_fc_ref, b_fc_ref,
                      o_ref, *, seq_len, batch):
    """Gridless fused RNN(relu) + Linear.  Everything VMEM-resident.

    x_ref    : (S*B, D)   time-major flattened input
    w_ih_ref : (D, Hp)    W_ih^T, hidden dim zero-padded to Hp
    w_hh_ref : (Hp, Hp)   W_hh^T, zero-padded
    b_rnn_ref: (1, Hp)    b_ih + b_hh, zero-padded
    w_fc_ref : (Hp, Op)   W_fc^T, padded rows/cols are zero
    b_fc_ref : (1, Op)    b_fc, zero-padded
    o_ref    : (S*B, Op)  lane-dense output (sliced to O outside)
    """
    hp = w_hh_ref.shape[0]

    # (1) Input projection hoisted out of the recurrence: one big MXU GEMM.
    u = (jnp.dot(x_ref[...], w_ih_ref[...], preferred_element_type=jnp.float32)
         + b_rnn_ref[...])                                   # (S*B, Hp)

    # (2) Serial ReLU recurrence.  seq_len is a small trace-time constant so
    #     it is fully unrolled; W_hh is loaded once (loop-invariant) and the
    #     hidden states stay in vregs (no VMEM scratch round-trip).
    w_hh = w_hh_ref[...]
    h = jnp.zeros((batch, hp), jnp.float32)                  # PyTorch h0 = 0
    hs = []
    for t in range(seq_len):
        pre = u[t * batch:(t + 1) * batch, :] + jnp.dot(
            h, w_hh, preferred_element_type=jnp.float32)
        h = jnp.maximum(pre, 0.0)                            # nonlinearity='relu'
        hs.append(h)
    h_all = jnp.concatenate(hs, axis=0)                      # (S*B, Hp), ~4 vregs

    # (3) Final Linear batched over all S*B rows, lane-dense output tile.
    o_ref[...] = (jnp.dot(h_all, w_fc_ref[...],
                          preferred_element_type=jnp.float32)
                  + b_fc_ref[...])


def prepare_weights(w_ih, w_hh, b_ih, b_hh, w_fc, b_fc):
    """One-time weight prep: transpose to x@W form, fold the two RNN biases,
    zero-pad H -> Hp (multiple of 128) and O -> Op (multiple of 128).

    Call this ONCE at init; pass the result to every forward call so the
    per-call path never rewrites the weights in HBM.
    """
    H, D = w_ih.shape
    O = w_fc.shape[0]
    Hp = max(_LANE, _round_up(H, _LANE))    # 240 -> 256
    Op = max(_LANE, _round_up(O, _LANE))    # 24  -> 128
    f32 = jnp.float32

    w_ih_t = jnp.zeros((D, Hp), f32).at[:, :H].set(w_ih.T.astype(f32))
    w_hh_t = jnp.zeros((Hp, Hp), f32).at[:H, :H].set(w_hh.T.astype(f32))
    b_rnn = jnp.zeros((1, Hp), f32).at[:, :H].set(
        (b_ih + b_hh).astype(f32)[None, :])
    w_fc_t = jnp.zeros((Hp, Op), f32).at[:H, :O].set(w_fc.T.astype(f32))
    b_fc_p = jnp.zeros((1, Op), f32).at[:, :O].set(b_fc.astype(f32)[None, :])
    return (w_ih_t, w_hh_t, b_rnn, w_fc_t, b_fc_p)


def custom_rnn_forward(x, params, *, out_dim):
    """x: (S, B, D) float32; params from prepare_weights()."""
    w_ih_t, w_hh_t, b_rnn, w_fc_t, b_fc_p = params
    S, B, D = x.shape
    Op = w_fc_t.shape[1]

    x_flat = x.reshape(S * B, D).astype(jnp.float32)   # free: collapse leading dims

    kernel = functools.partial(_fused_rnn_kernel, seq_len=S, batch=B)
    vmem = pltpu.MemorySpace.VMEM
    y_flat = pl.pallas_call(
        kernel,
        out_shape=jax.ShapeDtypeStruct((S * B, Op), jnp.float32),
        in_specs=[pl.BlockSpec(memory_space=vmem)] * 6,   # whole arrays in VMEM
        out_specs=pl.BlockSpec(memory_space=vmem),
    )(x_flat, w_ih_t, w_hh_t, b_rnn, w_fc_t, b_fc_p)

    return y_flat[:, :out_dim].reshape(S, B, out_dim)


def reference_forward(x, w_ih, w_hh, b_ih, b_hh, w_fc, b_fc):
    """Pure-JAX reference of the PyTorch forward (full-precision matmuls)."""
    hi = jax.lax.Precision.HIGHEST
    S, B, _ = x.shape
    H = w_hh.shape[0]

    def step(h, x_t):
        h_new = jax.nn.relu(jnp.dot(x_t, w_ih.T, precision=hi) + b_ih
                            + jnp.dot(h, w_hh.T, precision=hi) + b_hh)
        return h_new, h_new

    h0 = jnp.zeros((B, H), jnp.float32)
    _, hs = jax.lax.scan(step, h0, x)                     # (S, B, H)
    return jnp.dot(hs, w_fc.T, precision=hi) + b_fc       # (S, B, O)


if __name__ == "__main__":
    # Module dims (from __init__ defaults) + small seq/batch.
    D_IN, H, O = 1080, 240, 24
    S, B = 8, 2

    key = jax.random.PRNGKey(0)
    k = jax.random.split(key, 7)

    # PyTorch-style uniform(-1/sqrt(H), 1/sqrt(H)) init.
    bound = 1.0 / jnp.sqrt(jnp.float32(H))
    w_ih = jax.random.uniform(k[0], (H, D_IN), jnp.float32, -bound, bound)
    w_hh = jax.random.uniform(k[1], (H, H), jnp.float32, -bound, bound)
    b_ih = jax.random.uniform(k[2], (H,), jnp.float32, -bound, bound)
    b_hh = jax.random.uniform(k[3], (H,), jnp.float32, -bound, bound)
    w_fc = jax.random.uniform(k[4], (O, H), jnp.float32, -bound, bound)
    b_fc = jax.random.uniform(k[5], (O,), jnp.float32, -bound, bound)

    x = jax.random.normal(k[6], (S, B, D_IN), jnp.float32)

    # One-time weight preparation, hoisted out of the per-call path.
    params = prepare_weights(w_ih, w_hh, b_ih, b_hh, w_fc, b_fc)

    fwd = jax.jit(functools.partial(custom_rnn_forward, out_dim=O))
    out = jax.block_until_ready(fwd(x, params))

    ref = reference_forward(x, w_ih, w_hh, b_ih, b_hh, w_fc, b_fc)
    assert out.shape == (S, B, O), out.shape
    # Tolerance allows for reduced-precision f32 MXU passes inside the kernel;
    # pin lax.Precision.HIGHEST on the in-kernel dots if tighter is required.
    max_err = float(jnp.max(jnp.abs(out - ref)))
    assert jnp.allclose(out, ref, atol=5e-3, rtol=5e-3), max_err

    print("KERNEL_OK")
</pallas_src>

<mosaic_0001>
module attributes {stable_mosaic.version = 11 : i64} {
  func.func @_fused_rnn_kernel(%arg0: memref<16x1080xf32, #tpu.memory_space<vmem>>, %arg1: memref<1080x256xf32, #tpu.memory_space<vmem>>, %arg2: memref<256x256xf32, #tpu.memory_space<vmem>>, %arg3: memref<1x256xf32, #tpu.memory_space<vmem>>, %arg4: memref<256x128xf32, #tpu.memory_space<vmem>>, %arg5: memref<1x128xf32, #tpu.memory_space<vmem>>, %arg6: memref<16x128xf32, #tpu.memory_space<vmem>>) attributes {dimension_semantics = [], scalar_prefetch = 0 : i64, scratch_operands = 0 : i64, tpu.core_type = #tpu.core_type<tc>} {
    %c0 = arith.constant 0 : index
    %c0_0 = arith.constant 0 : index
    %0 = vector.load %arg0[%c0, %c0_0] : memref<16x1080xf32, #tpu.memory_space<vmem>>, vector<16x1080xf32>
    %c0_1 = arith.constant 0 : index
    %c0_2 = arith.constant 0 : index
    %1 = vector.load %arg1[%c0_1, %c0_2] : memref<1080x256xf32, #tpu.memory_space<vmem>>, vector<1080x256xf32>
    %cst = arith.constant dense<0.000000e+00> : vector<16x256xf32>
    %2 = tpu.matmul %0, %1, %cst {dimension_numbers = #tpu.dot_dimension_numbers<[1], [0], [0], [1], [0, 0, 1, 1], [], []>} : vector<16x1080xf32>, vector<1080x256xf32>, vector<16x256xf32> -> vector<16x256xf32>
    %c0_3 = arith.constant 0 : index
    %c0_4 = arith.constant 0 : index
    %3 = vector.load %arg3[%c0_3, %c0_4] : memref<1x256xf32, #tpu.memory_space<vmem>>, vector<1x256xf32>
    %4 = vector.broadcast %3 : vector<1x256xf32> to vector<16x256xf32>
    %5 = arith.addf %2, %4 : vector<16x256xf32>
    %c0_5 = arith.constant 0 : index
    %c0_6 = arith.constant 0 : index
    %6 = vector.load %arg2[%c0_5, %c0_6] : memref<256x256xf32, #tpu.memory_space<vmem>>, vector<256x256xf32>
    %cst_7 = arith.constant 0.000000e+00 : f32
    %7 = vector.broadcast %cst_7 : f32 to vector<2x256xf32>
    %8 = vector.extract_strided_slice %5 {offsets = [0, 0], sizes = [2, 256], strides = [1, 1]} : vector<16x256xf32> to vector<2x256xf32>
    %cst_8 = arith.constant dense<0.000000e+00> : vector<2x256xf32>
    %9 = tpu.matmul %7, %6, %cst_8 {dimension_numbers = #tpu.dot_dimension_numbers<[1], [0], [0], [1], [0, 0, 1, 1], [], []>} : vector<2x256xf32>, vector<256x256xf32>, vector<2x256xf32> -> vector<2x256xf32>
    %10 = arith.addf %8, %9 : vector<2x256xf32>
    %cst_9 = arith.constant 0.000000e+00 : f32
    %11 = vector.broadcast %cst_9 : f32 to vector<2x256xf32>
    %12 = arith.maximumf %10, %11 : vector<2x256xf32>
    %13 = vector.extract_strided_slice %5 {offsets = [2, 0], sizes = [2, 256], strides = [1, 1]} : vector<16x256xf32> to vector<2x256xf32>
    %cst_10 = arith.constant dense<0.000000e+00> : vector<2x256xf32>
    %14 = tpu.matmul %12, %6, %cst_10 {dimension_numbers = #tpu.dot_dimension_numbers<[1], [0], [0], [1], [0, 0, 1, 1], [], []>} : vector<2x256xf32>, vector<256x256xf32>, vector<2x256xf32> -> vector<2x256xf32>
    %15 = arith.addf %13, %14 : vector<2x256xf32>
    %cst_11 = arith.constant 0.000000e+00 : f32
    %16 = vector.broadcast %cst_11 : f32 to vector<2x256xf32>
    %17 = arith.maximumf %15, %16 : vector<2x256xf32>
    %18 = vector.extract_strided_slice %5 {offsets = [4, 0], sizes = [2, 256], strides = [1, 1]} : vector<16x256xf32> to vector<2x256xf32>
    %cst_12 = arith.constant dense<0.000000e+00> : vector<2x256xf32>
    %19 = tpu.matmul %17, %6, %cst_12 {dimension_numbers = #tpu.dot_dimension_numbers<[1], [0], [0], [1], [0, 0, 1, 1], [], []>} : vector<2x256xf32>, vector<256x256xf32>, vector<2x256xf32> -> vector<2x256xf32>
    %20 = arith.addf %18, %19 : vector<2x256xf32>
    %cst_13 = arith.constant 0.000000e+00 : f32
    %21 = vector.broadcast %cst_13 : f32 to vector<2x256xf32>
    %22 = arith.maximumf %20, %21 : vector<2x256xf32>
    %23 = vector.extract_strided_slice %5 {offsets = [6, 0], sizes = [2, 256], strides = [1, 1]} : vector<16x256xf32> to vector<2x256xf32>
    %cst_14 = arith.constant dense<0.000000e+00> : vector<2x256xf32>
    %24 = tpu.matmul %22, %6, %cst_14 {dimension_numbers = #tpu.dot_dimension_numbers<[1], [0], [0], [1], [0, 0, 1, 1], [], []>} : vector<2x256xf32>, vector<256x256xf32>, vector<2x256xf32> -> vector<2x256xf32>
    %25 = arith.addf %23, %24 : vector<2x256xf32>
    %cst_15 = arith.constant 0.000000e+00 : f32
    %26 = vector.broadcast %cst_15 : f32 to vector<2x256xf32>
    %27 = arith.maximumf %25, %26 : vector<2x256xf32>
    %28 = vector.extract_strided_slice %5 {offsets = [8, 0], sizes = [2, 256], strides = [1, 1]} : vector<16x256xf32> to vector<2x256xf32>
    %cst_16 = arith.constant dense<0.000000e+00> : vector<2x256xf32>
    %29 = tpu.matmul %27, %6, %cst_16 {dimension_numbers = #tpu.dot_dimension_numbers<[1], [0], [0], [1], [0, 0, 1, 1], [], []>} : vector<2x256xf32>, vector<256x256xf32>, vector<2x256xf32> -> vector<2x256xf32>
    %30 = arith.addf %28, %29 : vector<2x256xf32>
    %cst_17 = arith.constant 0.000000e+00 : f32
    %31 = vector.broadcast %cst_17 : f32 to vector<2x256xf32>
    %32 = arith.maximumf %30, %31 : vector<2x256xf32>
    %33 = vector.extract_strided_slice %5 {offsets = [10, 0], sizes = [2, 256], strides = [1, 1]} : vector<16x256xf32> to vector<2x256xf32>
    %cst_18 = arith.constant dense<0.000000e+00> : vector<2x256xf32>
    %34 = tpu.matmul %32, %6, %cst_18 {dimension_numbers = #tpu.dot_dimension_numbers<[1], [0], [0], [1], [0, 0, 1, 1], [], []>} : vector<2x256xf32>, vector<256x256xf32>, vector<2x256xf32> -> vector<2x256xf32>
    %35 = arith.addf %33, %34 : vector<2x256xf32>
    %cst_19 = arith.constant 0.000000e+00 : f32
    %36 = vector.broadcast %cst_19 : f32 to vector<2x256xf32>
    %37 = arith.maximumf %35, %36 : vector<2x256xf32>
    %38 = vector.extract_strided_slice %5 {offsets = [12, 0], sizes = [2, 256], strides = [1, 1]} : vector<16x256xf32> to vector<2x256xf32>
    %cst_20 = arith.constant dense<0.000000e+00> : vector<2x256xf32>
    %39 = tpu.matmul %37, %6, %cst_20 {dimension_numbers = #tpu.dot_dimension_numbers<[1], [0], [0], [1], [0, 0, 1, 1], [], []>} : vector<2x256xf32>, vector<256x256xf32>, vector<2x256xf32> -> vector<2x256xf32>
    %40 = arith.addf %38, %39 : vector<2x256xf32>
    %cst_21 = arith.constant 0.000000e+00 : f32
    %41 = vector.broadcast %cst_21 : f32 to vector<2x256xf32>
    %42 = arith.maximumf %40, %41 : vector<2x256xf32>
    %43 = vector.extract_strided_slice %5 {offsets = [14, 0], sizes = [2, 256], strides = [1, 1]} : vector<16x256xf32> to vector<2x256xf32>
    %cst_22 = arith.constant dense<0.000000e+00> : vector<2x256xf32>
    %44 = tpu.matmul %42, %6, %cst_22 {dimension_numbers = #tpu.dot_dimension_numbers<[1], [0], [0], [1], [0, 0, 1, 1], [], []>} : vector<2x256xf32>, vector<256x256xf32>, vector<2x256xf32> -> vector<2x256xf32>
    %45 = arith.addf %43, %44 : vector<2x256xf32>
    %cst_23 = arith.constant 0.000000e+00 : f32
    %46 = vector.broadcast %cst_23 : f32 to vector<2x256xf32>
    %47 = arith.maximumf %45, %46 : vector<2x256xf32>
    %48 = tpu.concatenate %12, %17, %22, %27, %32, %37, %42, %47 in 0 : vector<2x256xf32>, vector<2x256xf32>, vector<2x256xf32>, vector<2x256xf32>, vector<2x256xf32>, vector<2x256xf32>, vector<2x256xf32>, vector<2x256xf32> -> vector<16x256xf32>
    %c0_24 = arith.constant 0 : index
    %c0_25 = arith.constant 0 : index
    %49 = vector.load %arg4[%c0_24, %c0_25] : memref<256x128xf32, #tpu.memory_space<vmem>>, vector<256x128xf32>
    %cst_26 = arith.constant dense<0.000000e+00> : vector<16x128xf32>
    %50 = tpu.matmul %48, %49, %cst_26 {dimension_numbers = #tpu.dot_dimension_numbers<[1], [0], [0], [1], [0, 0, 1, 1], [], []>} : vector<16x256xf32>, vector<256x128xf32>, vector<16x128xf32> -> vector<16x128xf32>
    %c0_27 = arith.constant 0 : index
    %c0_28 = arith.constant 0 : index
    %51 = vector.load %arg5[%c0_27, %c0_28] : memref<1x128xf32, #tpu.memory_space<vmem>>, vector<1x128xf32>
    %52 = vector.broadcast %51 : vector<1x128xf32> to vector<16x128xf32>
    %53 = arith.addf %50, %52 : vector<16x128xf32>
    %c0_29 = arith.constant 0 : index
    %c0_30 = arith.constant 0 : index
    %54 = vector.load %arg6[%c0_29, %c0_30] : memref<16x128xf32, #tpu.memory_space<vmem>>, vector<16x128xf32>
    tpu.vector_store %arg6[%c0_29, %c0_30], %53 {strides = array<i32>} : memref<16x128xf32, #tpu.memory_space<vmem>>, vector<16x128xf32>,
    return
  }
}

</mosaic_0001>

<bundles_post_ra>
// kernel: custom_rnn_forward.1
= control target key start
LH: loop header
LB: loop body
LE: loop exit
PB: predicated region body
PF: predicated region fallthrough
CT: control target
= control target key end

     0   :  { %11 = vsyncpa [#allocation3], 0  ;;  %s3283_s0 = inlined_call_operand.vmem [shape: f32[16,1080], index: 0, kind: input, shape index: {}]   ;;  %s3284_s1 = inlined_call_operand.hbm [shape: f32[1080,256], index: 1, kind: input, shape index: {}]   ;;  %s3285_s2 = inlined_call_operand.hbm [shape: f32[256,256], index: 2, kind: input, shape index: {}]   ;;  %s3286_s3 = inlined_call_operand.hbm [shape: f32[1,256], index: 3, kind: input, shape index: {}]   ;;  %s3287_s4 = inlined_call_operand.hbm [shape: f32[256,128], index: 4, kind: input, shape index: {}]   ;;  %s3288_s5 = inlined_call_operand.hbm [shape: f32[1,128], index: 5, kind: input, shape index: {}]   ;;  %s3289_s6 = inlined_call_operand.hbm [shape: f32[16,128], index: 6, kind: output, shape index: {}]  }
   0x1   :  { %12 = vsyncpa [#allocation6], 0 }
   0x2   :  { %13 = vsyncpa [#allocation9], 0 }
   0x3   :  { %14 = vsyncpa [#allocation4], 0  ;;  %s2684_s21 = smov [#allocation5]   ;;  %s2685_s23 = smov [#allocation8]  }
   0x4   :  { %s34_s22 = sshll.u32 %s2684_s21, 4  ;;  %s56_s24 = sshll.u32 %s2685_s23, 4  ;;  %s35_s22 = int_to_ptr.vmem [resolvable:$true] %s34_s22  ;;  %s2730_s24 = int_to_ptr.vmem [resolvable:$true] %s56_s24 }
   0x5   :  { %s2544_s27 = scalar_lea.hbm %s3285_s2, 8192 }
   0x6   :  { %p2545_p0 = scmp.ne.s32.totalorder %s3285_s2, %s2544_s27  ;;  %p2548_p1 = scmp.lt.u32.totalorder %s2544_s27, %s3285_s2 }
   0x8   :  { %p2550_p2 = pnand %p2548_p1, %p2545_p0 }
   0xa   :  { %2553 = shalt.err (!%p2550_p2)
}
   0xb   :  { %s2554_s8 = scalar_lea.vmem %s35_s22, 8192  ;;  %p2559_p4 = scmp.lt.s32.totalorder %s35_s22, %s35_s22 }
   0xc   :  { %p2555_p3 = scmp.ne.s32.totalorder %s35_s22, %s2554_s8  ;;  %p2560_p5 = scmp.lt.s32.totalorder %s2554_s8, %s2554_s8 }
   0xe   :  { %p2561_p6 = por %p2560_p5, %p2559_p4 }
  0x10   :  { %p2562_p7 = pnand %p2561_p6, %p2555_p3 }
  0x12   :  { %2565 = shalt.err (!%p2562_p7)
}
  0x13   :  { %s2686_s9 = smov 256   ;;  %s2687_s10 = smov 16  }
  0x14   :  { %40 = dma.hbm_to_vmem [thread:$0]  %s3285_s2, 8192, %s35_s22, [#allocation6], %s2686_s9, %s2686_s9, %s2687_s10  }
  0x15   :  { %s2566_s15 = scalar_lea.hbm %s3287_s4, 4096 }
  0x16   :  { %p2567_p8 = scmp.ne.s32.totalorder %s3287_s4, %s2566_s15  ;;  %p2570_p9 = scmp.lt.u32.totalorder %s2566_s15, %s3287_s4 }
  0x18   :  { %p2572_p10 = pnand %p2570_p9, %p2567_p8 }
  0x1a   :  { %2575 = shalt.err (!%p2572_p10)
}
  0x1b   :  { %s2576_s20 = scalar_lea.vmem %s2730_s24, 4096  ;;  %p2581_p12 = scmp.lt.s32.totalorder %s2730_s24, %s2730_s24 }
  0x1c   :  { %p2577_p11 = scmp.ne.s32.totalorder %s2730_s24, %s2576_s20  ;;  %p2582_p13 = scmp.lt.s32.totalorder %s2576_s20, %s2576_s20 }
  0x1e   :  { %p2583_p0 = por %p2582_p13, %p2581_p12 }
  0x20   :  { %p2584_p1 = pnand %p2583_p0, %p2577_p11 }
  0x22   :  { %2587 = shalt.err (!%p2584_p1)
}
  0x23   :  { %s2688_s2 = smov 128   ;;  %s2689_s21 = smov 8  }
  0x24   :  { %62 = dma.hbm_to_vmem [thread:$0]  %s3287_s4, 4096, %s2730_s24, [#allocation9], %s2688_s2, %s2688_s2, %s2689_s21  }
  0x25   :  { %s2690_s25 = smov [#allocation2]   ;;  %s2691_s27 = smov [#allocation7]  }
  0x26   :  { %s22_s26 = sshll.u32 %s2690_s25, 4  ;;  %s47_s28 = sshll.u32 %s2691_s27, 4  ;;  %s23_s26 = int_to_ptr.vmem [resolvable:$true] %s22_s26  ;;  %s48_s28 = int_to_ptr.vmem [resolvable:$true] %s47_s28 }
  0x27   :  { %s2588_s7 = scalar_lea.hbm %s3284_s1, 34560 }
  0x28   :  { %p2589_p2 = scmp.ne.s32.totalorder %s3284_s1, %s2588_s7  ;;  %p2592_p3 = scmp.lt.u32.totalorder %s2588_s7, %s3284_s1 }
  0x2a   :  { %p2594_p4 = pnand %p2592_p3, %p2589_p2 }
  0x2c   :  { %2597 = shalt.err (!%p2594_p4)
}
  0x2d   :  { %s2598_s4 = scalar_lea.vmem %s23_s26, 34560  ;;  %p2603_p6 = scmp.lt.s32.totalorder %s23_s26, %s23_s26 }
  0x2e   :  { %p2599_p5 = scmp.ne.s32.totalorder %s23_s26, %s2598_s4  ;;  %p2604_p7 = scmp.lt.s32.totalorder %s2598_s4, %s2598_s4 }
  0x30   :  { %p2605_p8 = por %p2604_p7, %p2603_p6 }
  0x32   :  { %p2606_p9 = pnand %p2605_p8, %p2599_p5 }
  0x34   :  { %2609 = shalt.err (!%p2606_p9)
}
  0x35   :  { %28 = dma.hbm_to_vmem [thread:$0]  %s3284_s1, 34560, %s23_s26, [#allocation3], %s2686_s9, %s2686_s9, %s2687_s10  }
  0x36   :  { %s2610_s17 = scalar_lea.hbm %s3286_s3, 32 }
  0x37   :  { %p2611_p10 = scmp.ne.s32.totalorder %s3286_s3, %s2610_s17  ;;  %p2614_p11 = scmp.lt.u32.totalorder %s2610_s17, %s3286_s3 }
  0x39   :  { %p2616_p12 = pnand %p2614_p11, %p2611_p10 }
  0x3b   :  { %2619 = shalt.err (!%p2616_p12)
}
  0x3c   :  { %s2620_s23 = scalar_lea.vmem %s48_s28, 32  ;;  %p2625_p0 = scmp.lt.s32.totalorder %s48_s28, %s48_s28 }
  0x3d   :  { %p2621_p13 = scmp.ne.s32.totalorder %s48_s28, %s2620_s23  ;;  %p2626_p1 = scmp.lt.s32.totalorder %s2620_s23, %s2620_s23 }
  0x3f   :  { %p2627_p2 = por %p2626_p1, %p2625_p0 }
  0x41   :  { %p2628_p3 = pnand %p2627_p2, %p2621_p13 }
  0x43   :  { %2631 = shalt.err (!%p2628_p3)
}
  0x44   :  { %50 = dma.hbm_to_vmem [thread:$0]  %s3286_s3, 32, %s48_s28, [#allocation6]  }
  0x45   :  { %s2692_s10 = smov [#allocation10]   ;;  %s2632_s29 = scalar_lea.hbm %s3288_s5, 16 }
  0x46   :  { %s69_s25 = sshll.u32 %s2692_s10, 4  ;;  %p2633_p4 = scmp.ne.s32.totalorder %s3288_s5, %s2632_s29  ;;  %s70_s25 = int_to_ptr.vmem [resolvable:$true] %s69_s25 }
  0x47   :  { %p2636_p5 = scmp.lt.u32.totalorder %s2632_s29, %s3288_s5 }
  0x49   :  { %p2638_p6 = pnand %p2636_p5, %p2633_p4 }
  0x4b   :  { %2641 = shalt.err (!%p2638_p6)
}
  0x4c   :  { %s2642_s12 = scalar_lea.vmem %s70_s25, 16  ;;  %s2646_s3 = scalar_lea.vmem %s70_s25, 32 }
  0x4d   :  { %p2643_p7 = scmp.ne.s32.totalorder %s70_s25, %s2642_s12  ;;  %p2647_p8 = scmp.lt.s32.totalorder %s70_s25, %s70_s25 }
  0x4e   :  { %p2648_p9 = scmp.lt.s32.totalorder %s2646_s3, %s2642_s12 }
  0x50   :  { %p2649_p10 = por %p2648_p9, %p2647_p8 }
  0x52   :  { %p2650_p11 = pnand %p2649_p10, %p2643_p7 }
  0x54   :  { %2653 = shalt.err (!%p2650_p11)
}
  0x55   :  { %72 = dma.hbm_to_vmem [thread:$0]  %s3288_s5, 16, %s70_s25, [#allocation9]  }
  0x56   :  { %2676 = dma.done.wait [#allocation3], 34560  }
  0x57   :  { %2677 = vsyncadd [#allocation3], 4294932736 }
  0x58   :  { %2678 = dma.done.wait [#allocation6], 8224  }
  0x59   :  { %2679 = vsyncadd [#allocation6], 4294959072 }
  0x5a   :  { %2680 = dma.done.wait [#allocation9], 4112  }
  0x5b   :  { %2681 = vsyncadd [#allocation9], 4294963184  ;;  %v107_v0 = vld [vmem:[#allocation2 + $0x8] sm:$0xff]  ;;  %v109_v1 = vld [vmem:[#allocation2 + $0x18] sm:$0xff]  ;;  %vm388_vm0 = vcmask 457728   ;;  %vm1510_vm1 = vcmask 1041408  }
  0x5c   :  { %v106_v2 = vld [vmem:[#allocation2] sm:$0xff]  ;;  %v1701_v3 = vpack.c.bf16 %v109_v1, %v107_v0  ;;  %v108_v4 = vld [vmem:[#allocation2 + $0x10] sm:$0xff]  ;;  %v111_v5 = vld [vmem:[#allocation2 + $0x28] sm:$0xff]  ;;  %vm1513_vm2 = vcmask 1043456   ;;  %vm1516_vm3 = vcmask 1045504  }
  0x5d   :  { %v113_v6 = vld [vmem:[#allocation2 + $0x38] sm:$0xff]  ;;  %v1703_v7 = vpack.c.bf16 %v108_v4, %v106_v2  ;;  %v110_v9 = vld [vmem:[#allocation2 + $0x20] sm:$0xff]  ;;  %v112_v10 = vld [vmem:[#allocation2 + $0x30] sm:$0xff] }
  0x5e   :  { %v1705_v8 = vpack.c.bf16 %v113_v6, %v111_v5  ;;  %v115_v11 = vld [vmem:[#allocation2 + $0x48] sm:$0xff]  ;;  %1702 = vmatprep.subr.bf16.mxu0 %v1701_v3  ;;  %v117_v12 = vld [vmem:[#allocation2 + $0x58] sm:$0xff]  ;;  %v1707_v13 = vpack.c.bf16 %v112_v10, %v110_v9  ;;  %v114_v15 = vld [vmem:[#allocation2 + $0x40] sm:$0xff] }
  0x5f   :  { %1704 = vmatpush1.bf16.msra.mxu0 %v1703_v7  ;;  %v1709_v14 = vpack.c.bf16 %v117_v12, %v115_v11  ;;  %v116_v16 = vld [vmem:[#allocation2 + $0x50] sm:$0xff]  ;;  %v119_v17 = vld [vmem:[#allocation2 + $0x68] sm:$0xff]  ;;  %v121_v18 = vld [vmem:[#allocation2 + $0x78] sm:$0xff] }
  0x60   :  { %1706 = vmatprep.subr.bf16.mxu0 %v1705_v8  ;;  %v1711_v19 = vpack.c.bf16 %v116_v16, %v114_v15  ;;  %v1713_v20 = vpack.c.bf16 %v121_v18, %v119_v17  ;;  %v118_v21 = vld [vmem:[#allocation2 + $0x60] sm:$0xff]  ;;  %v120_v22 = vld [vmem:[#allocation2 + $0x70] sm:$0xff]  ;;  %v123_v23 = vld [vmem:[#allocation2 + $0x88] sm:$0xff] }
  0x61   :  { %v125_v24 = vld [vmem:[#allocation2 + $0x98] sm:$0xff]  ;;  %v1715_v25 = vpack.c.bf16 %v120_v22, %v118_v21  ;;  %v122_v27 = vld [vmem:[#allocation2 + $0x80] sm:$0xff]  ;;  %v124_v28 = vld [vmem:[#allocation2 + $0x90] sm:$0xff] }
  0x62   :  { %v1717_v26 = vpack.c.bf16 %v125_v24, %v123_v23  ;;  %v127_v29 = vld [vmem:[#allocation2 + $0xa8] sm:$0xff]  ;;  %v129_v30 = vld [vmem:[#allocation2 + $0xb8] sm:$0xff]  ;;  %v1719_v31 = vpack.c.bf16 %v124_v28, %v122_v27  ;;  %v126_v33 = vld [vmem:[#allocation2 + $0xa0] sm:$0xff] }
  0x63   :  { %1708 = vmatpush1.bf16.msra.mxu0 %v1707_v13  ;;  %v1721_v32 = vpack.c.bf16 %v129_v30, %v127_v29  ;;  %v128_v34 = vld [vmem:[#allocation2 + $0xb0] sm:$0xff]  ;;  %v131_v35 = vld [vmem:[#allocation2 + $0xc8] sm:$0xff]  ;;  %v133_v36 = vld [vmem:[#allocation2 + $0xd8] sm:$0xff] }
  0x64   :  { %1710 = vmatprep.subr.bf16.mxu0 %v1709_v14  ;;  %v1723_v37 = vpack.c.bf16 %v128_v34, %v126_v33  ;;  %v1725_v38 = vpack.c.bf16 %v133_v36, %v131_v35  ;;  %v130_v39 = vld [vmem:[#allocation2 + $0xc0] sm:$0xff]  ;;  %v132_v40 = vld [vmem:[#allocation2 + $0xd0] sm:$0xff]  ;;  %v89_v41 = vld [vmem:[%s3283_s0 + $0x8] sm:$0xff] }
  0x65   :  { %v135_v42 = vld [vmem:[#allocation2 + $0xe8] sm:$0xff]  ;;  %v137_v43 = vld [vmem:[#allocation2 + $0xf8] sm:$0xff]  ;;  %459 = vmatprep.mubr.f32.mxu0 %v89_v41  ;;  %v1727_v44 = vpack.c.bf16 %v132_v40, %v130_v39  ;;  %v134_v46 = vld [vmem:[#allocation2 + $0xe0] sm:$0xff] }
  0x66   :  { %v1729_v45 = vpack.c.bf16 %v137_v43, %v135_v42  ;;  %v136_v47 = vld [vmem:[#allocation2 + $0xf0] sm:$0xff]  ;;  %v139_v48 = vld [vmem:[#allocation2 + $0x108] sm:$0xff]  ;;  %v141_v49 = vld [vmem:[#allocation2 + $0x118] sm:$0xff] }
  0x67   :  { %1712 = vmatpush1.bf16.msra.mxu0 %v1711_v19  ;;  %v1731_v50 = vpack.c.bf16 %v136_v47, %v134_v46  ;;  %v1733_v51 = vpack.c.bf16 %v141_v49, %v139_v48  ;;  %v138_v52 = vld [vmem:[#allocation2 + $0x100] sm:$0xff]  ;;  %v140_v53 = vld [vmem:[#allocation2 + $0x110] sm:$0xff]  ;;  %v143_v54 = vld [vmem:[#allocation2 + $0x128] sm:$0xff] }
  0x68   :  { %1714 = vmatprep.subr.bf16.mxu0 %v1713_v20  ;;  %v145_v55 = vld [vmem:[#allocation2 + $0x138] sm:$0xff]  ;;  %v1735_v56 = vpack.c.bf16 %v140_v53, %v138_v52  ;;  %v142_v58 = vld [vmem:[#allocation2 + $0x120] sm:$0xff]  ;;  %v144_v59 = vld [vmem:[#allocation2 + $0x130] sm:$0xff] }
  0x69   :  { %v1737_v57 = vpack.c.bf16 %v145_v55, %v143_v54  ;;  %v147_v60 = vld [vmem:[#allocation2 + $0x148] sm:$0xff]  ;;  %v149_v61 = vld [vmem:[#allocation2 + $0x158] sm:$0xff]  ;;  %v1739_v62 = vpack.c.bf16 %v144_v59, %v142_v58  ;;  %v146_v0 = vld [vmem:[#allocation2 + $0x140] sm:$0xff] }
  0x6a   :  { %v1741_v63 = vpack.c.bf16 %v149_v61, %v147_v60  ;;  %v148_v1 = vld [vmem:[#allocation2 + $0x150] sm:$0xff]  ;;  %v151_v2 = vld [vmem:[#allocation2 + $0x168] sm:$0xff]  ;;  %v153_v3 = vld [vmem:[#allocation2 + $0x178] sm:$0xff] }
  0x6b   :  { %1716 = vmatpush1.bf16.msra.mxu0 %v1715_v25  ;;  %v1743_v4 = vpack.c.bf16 %v148_v1, %v146_v0  ;;  %v1745_v5 = vpack.c.bf16 %v153_v3, %v151_v2  ;;  %v150_v6 = vld [vmem:[#allocation2 + $0x160] sm:$0xff]  ;;  %v152_v7 = vld [vmem:[#allocation2 + $0x170] sm:$0xff]  ;;  %v155_v8 = vld [vmem:[#allocation2 + $0x188] sm:$0xff] }
  0x6c   :  { %1718 = vmatprep.subr.bf16.mxu0 %v1717_v26  ;;  %v157_v9 = vld [vmem:[#allocation2 + $0x198] sm:$0xff]  ;;  %v1747_v10 = vpack.c.bf16 %v152_v7, %v150_v6  ;;  %v154_v12 = vld [vmem:[#allocation2 + $0x180] sm:$0xff]  ;;  %v156_v13 = vld [vmem:[#allocation2 + $0x190] sm:$0xff] }
  0x6d   :  { %v1749_v11 = vpack.c.bf16 %v157_v9, %v155_v8  ;;  %v159_v14 = vld [vmem:[#allocation2 + $0x1a8] sm:$0xff]  ;;  %v161_v15 = vld [vmem:[#allocation2 + $0x1b8] sm:$0xff]  ;;  %v1751_v16 = vpack.c.bf16 %v156_v13, %v154_v12  ;;  %v158_v18 = vld [vmem:[#allocation2 + $0x1a0] sm:$0xff] }
  0x6e   :  { %v1753_v17 = vpack.c.bf16 %v161_v15, %v159_v14  ;;  %v160_v19 = vld [vmem:[#allocation2 + $0x1b0] sm:$0xff]  ;;  %v163_v20 = vld [vmem:[#allocation2 + $0x1c8] sm:$0xff]  ;;  %v165_v21 = vld [vmem:[#allocation2 + $0x1d8] sm:$0xff] }
  0x6f   :  { %1720 = vmatpush1.bf16.msra.mxu0 %v1719_v31  ;;  %v1755_v22 = vpack.c.bf16 %v160_v19, %v158_v18  ;;  %v1757_v23 = vpack.c.bf16 %v165_v21, %v163_v20  ;;  %v162_v24 = vld [vmem:[#allocation2 + $0x1c0] sm:$0xff]  ;;  %v164_v25 = vld [vmem:[#allocation2 + $0x1d0] sm:$0xff]  ;;  %v167_v26 = vld [vmem:[#allocation2 + $0x1e8] sm:$0xff] }
  0x70   :  { %1722 = vmatprep.subr.bf16.mxu0 %v1721_v32  ;;  %v169_v27 = vld [vmem:[#allocation2 + $0x1f8] sm:$0xff]  ;;  %v1759_v28 = vpack.c.bf16 %v164_v25, %v162_v24  ;;  %v166_v30 = vld [vmem:[#allocation2 + $0x1e0] sm:$0xff]  ;;  %v168_v31 = vld [vmem:[#allocation2 + $0x1f0] sm:$0xff] }
  0x71   :  { %v1761_v29 = vpack.c.bf16 %v169_v27, %v167_v26  ;;  %v171_v32 = vld [vmem:[#allocation2 + $0x208] sm:$0xff]  ;;  %v173_v33 = vld [vmem:[#allocation2 + $0x218] sm:$0xff]  ;;  %v1763_v34 = vpack.c.bf16 %v168_v31, %v166_v30  ;;  %v170_v36 = vld [vmem:[#allocation2 + $0x200] sm:$0xff] }
  0x72   :  { %v1765_v35 = vpack.c.bf16 %v173_v33, %v171_v32  ;;  %v177_v39 = vld [vmem:[#allocation2 + $0x238] sm:$0xff]  ;;  %v88_v40 = vld [vmem:[%s3283_s0] sm:$0xff]  ;;  %v174_v43 = vld [vmem:[#allocation2 + $0x220] sm:$0xff] }
  0x73   :  { %1724 = vmatpush1.bf16.msra.mxu0 %v1723_v37  ;;  %v172_v37 = vld [vmem:[#allocation2 + $0x210] sm:$0xff]  ;;  %v179_v46 = vld [vmem:[#allocation2 + $0x248] sm:$0xff]  ;;  %v181_v47 = vld [vmem:[#allocation2 + $0x258] sm:$0xff] }
  0x74   :  { %1726 = vmatprep.subr.bf16.mxu0 %v1725_v38  ;;  %v175_v38 = vld [vmem:[#allocation2 + $0x228] sm:$0xff]  ;;  %v1767_v41 = vpack.c.bf16 %v172_v37, %v170_v36  ;;  %v97_v49 = vld [vmem:[%s3283_s0 + $0x48] sm:$0xff]  ;;  %v180_v52 = vld [vmem:[#allocation2 + $0x250] sm:$0xff] }
  0x75   :  { %v1769_v42 = vpack.c.bf16 %v177_v39, %v175_v38  ;;  %v91_v53 = vld [vmem:[%s3283_s0 + $0x18] sm:$0xff]  ;;  %v185_v55 = vld [vmem:[#allocation2 + $0x278] sm:$0xff]  ;;  %v182_v58 = vld [vmem:[#allocation2 + $0x260] sm:$0xff] }
  0x76   :  { %v183_v54 = vld [vmem:[#allocation2 + $0x268] sm:$0xff]  ;;  %v184_v59 = vld [vmem:[#allocation2 + $0x270] sm:$0xff]  ;;  %v189_v61 = vld [vmem:[#allocation2 + $0x298] sm:$0xff] }
  0x77   :  { %1728 = vmatpush1.bf16.msra.mxu0 %v1727_v44  ;;  %v176_v44 = vld [vmem:[#allocation2 + $0x230] sm:$0xff]  ;;  %v187_v60 = vld [vmem:[#allocation2 + $0x288] sm:$0xff]  ;;  %v186_v0 = vld [vmem:[#allocation2 + $0x280] sm:$0xff] }
  0x78   :  { %1730 = vmatprep.subr.bf16.mxu0 %v1729_v45  ;;  %v98_v45 = vld [vmem:[%s3283_s0 + $0x50] sm:$0xff]  ;;  %v1771_v48 = vpack.c.bf16 %v176_v44, %v174_v43  ;;  %v188_v1 = vld [vmem:[#allocation2 + $0x290] sm:$0xff]  ;;  %v191_v2 = vld [vmem:[#allocation2 + $0x2a8] sm:$0xff] }
  0x79   :  { %v193_v3 = vld [vmem:[#allocation2 + $0x2b8] sm:$0xff]  ;;  %v1783_v6 = vpack.c.bf16 %v188_v1, %v186_v0  ;;  %v780_v8 = vld [vmem:[#allocation5] sm:$0xff]  ;;  %v782_v12 = vld [vmem:[#allocation5 + $0x10] sm:$0xff] }
  0x7a   :  { %v1785_v9 = vpack.c.bf16 %v193_v3, %v191_v2  ;;  %v195_v13 = vld [vmem:[#allocation2 + $0x2c8] sm:$0xff]  ;;  %v197_v14 = vld [vmem:[#allocation2 + $0x2d8] sm:$0xff]  ;;  %v2824_v15 = vpack.c.bf16 %v782_v12, %v780_v8  ;;  %v784_v20 = vld [vmem:[#allocation5 + $0x20] sm:$0xff] }
  0x7b   :  { %1732 = vmatpush1.bf16.msra.mxu0 %v1731_v50  ;;  %v1773_v50 = vpack.c.bf16 %v181_v47, %v179_v46  ;;  %v1789_v21 = vpack.c.bf16 %v197_v14, %v195_v13  ;;  %v786_v24 = vld [vmem:[#allocation5 + $0x30] sm:$0xff]  ;;  %v199_v25 = vld [vmem:[#allocation2 + $0x2e8] sm:$0xff]  ;;  %v201_v26 = vld [vmem:[#allocation2 + $0x2f8] sm:$0xff] }
  0x7c   :  { %1734 = vmatprep.subr.bf16.mxu0 %v1733_v51  ;;  %v178_v51 = vld [vmem:[#allocation2 + $0x240] sm:$0xff]  ;;  %v2830_v27 = vpack.c.bf16 %v786_v24, %v784_v20  ;;  %v788_v32 = vld [vmem:[#allocation5 + $0x40] sm:$0xff]  ;;  %v1793_v33 = vpack.c.bf16 %v201_v26, %v199_v25  ;;  %v203_v37 = vld [vmem:[#allocation2 + $0x308] sm:$0xff] }
  0x7d   :  { %v790_v36 = vld [vmem:[#allocation5 + $0x50] sm:$0xff]  ;;  %v205_v38 = vld [vmem:[#allocation2 + $0x318] sm:$0xff]  ;;  %v792_v44 = vld [vmem:[#allocation5 + $0x60] sm:$0xff] }
  0x7e   :  { %v2836_v39 = vpack.c.bf16 %v790_v36, %v788_v32  ;;  %v202_v46 = vld [vmem:[#allocation2 + $0x300] sm:$0xff]  ;;  %v204_v47 = vld [vmem:[#allocation2 + $0x310] sm:$0xff]  ;;  %v801_v0 = vld [vmem:[#allocation5 + $0xa8] sm:$0xff] }
  0x7f   :  { %1736 = vmatpush1.bf16.msra.mxu0 %v1735_v56  ;;  %v1775_v56 = vpack.c.bf16 %v180_v52, %v178_v51  ;;  %v797_v52 = vld [vmem:[#allocation5 + $0x88] sm:$0xff]  ;;  %v803_v1 = vld [vmem:[#allocation5 + $0xb8] sm:$0xff]  ;;  %v212_v8 = vld [vmem:[#allocation2 + $0x350] sm:$0xff] }
  0x80   :  { %1738 = vmatprep.subr.bf16.mxu0 %v1737_v57  ;;  %v1777_v57 = vpack.c.bf16 %v185_v55, %v183_v54  ;;  %v1799_v54 = vpack.c.bf16 %v204_v47, %v202_v46  ;;  %v2851_v3 = vpack.c.bf16 %v803_v1, %v801_v0  ;;  %v805_v13 = vld [vmem:[#allocation5 + $0xc8] sm:$0xff]  ;;  %v807_v14 = vld [vmem:[#allocation5 + $0xd8] sm:$0xff]  ;;  %v220_v36 = vld [vmem:[#allocation2 + $0x390] sm:$0xff] }
  0x81   :  { %v219_v24 = vld [vmem:[#allocation2 + $0x388] sm:$0xff]  ;;  %v221_v25 = vld [vmem:[#allocation2 + $0x398] sm:$0xff]  ;;  %v812_v47 = vld [vmem:[#allocation5 + $0x100] sm:$0xff] }
  0x82   :  { %v226_v0 = vld [vmem:[#allocation2 + $0x3c0] sm:$0xff]  ;;  %v228_v1 = vld [vmem:[#allocation2 + $0x3d0] sm:$0xff] }
  0x83   :  { %1740 = vmatpush1.bf16.msra.mxu0 %v1739_v62  ;;  %v1779_v62 = vpack.c.bf16 %v184_v59, %v182_v58  ;;  %v206_v58 = vld [vmem:[#allocation2 + $0x320] sm:$0xff]  ;;  %v208_v59 = vld [vmem:[#allocation2 + $0x330] sm:$0xff] }
  0x84   :  { %1742 = vmatprep.subr.bf16.mxu0 %v1741_v63  ;;  %v1781_v63 = vpack.c.bf16 %v189_v61, %v187_v60  ;;  %v798_v60 = vld [vmem:[#allocation5 + $0x90] sm:$0xff]  ;;  %v211_v61 = vld [vmem:[#allocation2 + $0x348] sm:$0xff]  ;;  %v1803_v2 = vpack.c.bf16 %v208_v59, %v206_v58 }
  0x85   :  { %v819_v58 = vld [vmem:[#allocation5 + $0x138] sm:$0xff] }
  0x87   :  { %1744 = vmatpush1.bf16.msra.mxu0 %v1743_v4  ;;  %v781_v4 = vld [vmem:[#allocation5 + $0x8] sm:$0xff] }
  0x88   :  { %1746 = vmatprep.subr.bf16.mxu0 %v1745_v5  ;;  %v783_v5 = vld [vmem:[#allocation5 + $0x18] sm:$0xff] }
  0x89   :  { %v2821_v7 = vpack.c.bf16 %v783_v5, %v781_v4  ;;  %v800_v4 = vld [vmem:[#allocation5 + $0xa0] sm:$0xff] }
  0x8b   :  { %1748 = vmatpush1.bf16.msra.mxu0 %v1747_v10  ;;  %v190_v10 = vld [vmem:[#allocation2 + $0x2a0] sm:$0xff]  ;;  %1970 = vmatprep.subr.bf16.mxu1 %v2821_v7 }
  0x8c   :  { %1750 = vmatprep.subr.bf16.mxu0 %v1749_v11  ;;  %v192_v11 = vld [vmem:[#allocation2 + $0x2b0] sm:$0xff]  ;;  %1972 = vmatpush1.bf16.msra.mxu1 %v2824_v15 }
  0x8d   :  { %v1787_v18 = vpack.c.bf16 %v192_v11, %v190_v10  ;;  %v215_v10 = vld [vmem:[#allocation2 + $0x368] sm:$0xff]  ;;  %v217_v11 = vld [vmem:[#allocation2 + $0x378] sm:$0xff] }
  0x8e   :  { %v1809_v20 = vpack.c.bf16 %v217_v11, %v215_v10  ;;  %v1823_v10 = vpack.c.bf16 %v228_v1, %v226_v0  ;;  %v835_v0 = vld [vmem:[#allocation5 + $0x1b8] sm:$0xff] }
  0x8f   :  { %1752 = vmatpush1.bf16.msra.mxu0 %v1751_v16  ;;  %v785_v16 = vld [vmem:[#allocation5 + $0x28] sm:$0xff] }
  0x90   :  { %1754 = vmatprep.subr.bf16.mxu0 %v1753_v17  ;;  %v787_v17 = vld [vmem:[#allocation5 + $0x38] sm:$0xff] }
  0x91   :  { %v2827_v19 = vpack.c.bf16 %v787_v17, %v785_v16  ;;  %v2857_v17 = vpack.c.bf16 %v807_v14, %v805_v13  ;;  %v820_v13 = vld [vmem:[#allocation5 + $0x140] sm:$0xff] }
  0x93   :  { %1756 = vmatpush1.bf16.msra.mxu0 %v1755_v22  ;;  %v194_v22 = vld [vmem:[#allocation2 + $0x2c0] sm:$0xff]  ;;  %1974 = vmatprep.subr.bf16.mxu1 %v2827_v19 }
  0x94   :  { %1758 = vmatprep.subr.bf16.mxu0 %v1757_v23  ;;  %v196_v23 = vld [vmem:[#allocation2 + $0x2d0] sm:$0xff]  ;;  %1976 = vmatpush1.bf16.msra.mxu1 %v2830_v27 }
  0x95   :  { %v1791_v30 = vpack.c.bf16 %v196_v23, %v194_v22  ;;  %v216_v22 = vld [vmem:[#allocation2 + $0x370] sm:$0xff]  ;;  %v806_v23 = vld [vmem:[#allocation5 + $0xd0] sm:$0xff] }
  0x97   :  { %1760 = vmatpush1.bf16.msra.mxu0 %v1759_v28  ;;  %v789_v28 = vld [vmem:[#allocation5 + $0x48] sm:$0xff] }
  0x98   :  { %1762 = vmatprep.subr.bf16.mxu0 %v1761_v29  ;;  %v791_v29 = vld [vmem:[#allocation5 + $0x58] sm:$0xff] }
  0x99   :  { %v2833_v31 = vpack.c.bf16 %v791_v29, %v789_v28  ;;  %v809_v28 = vld [vmem:[#allocation5 + $0xe8] sm:$0xff]  ;;  %v811_v29 = vld [vmem:[#allocation5 + $0xf8] sm:$0xff] }
  0x9a   :  { %v2863_v32 = vpack.c.bf16 %v811_v29, %v809_v28 }
  0x9b   :  { %1764 = vmatpush1.bf16.msra.mxu0 %v1763_v34  ;;  %v198_v34 = vld [vmem:[#allocation2 + $0x2e0] sm:$0xff]  ;;  %1978 = vmatprep.subr.bf16.mxu1 %v2833_v31 }
  0x9c   :  { %1766 = vmatprep.subr.bf16.mxu0 %v1765_v35  ;;  %v200_v35 = vld [vmem:[#allocation2 + $0x2f0] sm:$0xff]  ;;  %1980 = vmatpush1.bf16.msra.mxu1 %v2836_v39 }
  0x9e   :  { %460 = vmatmul.mubr.f32.vlgmr.msra.gmra.mrb[0].mxu0 %v88_v40  ;;  %v793_v40 = vld [vmem:[#allocation5 + $0x68] sm:$0xff] }
  0x9f   :  { %1768 = vmatpush1.bf16.msra.mxu0 %v1767_v41  ;;  %465 = vmatprep.mubr.f32.mxu0 %v98_v45  ;;  %v795_v41 = vld [vmem:[#allocation5 + $0x78] sm:$0xff]  ;;  %v1797_v45 = vpack.c.bf16 %v205_v38, %v203_v37  ;;  %v810_v37 = vld [vmem:[#allocation5 + $0xf0] sm:$0xff] }
  0xa0   :  { %1770 = vmatprep.subr.bf16.mxu0 %v1769_v42  ;;  %v1795_v42 = vpack.c.bf16 %v200_v35, %v198_v34  ;;  %v2839_v43 = vpack.c.bf16 %v795_v41, %v793_v40  ;;  %v1813_v34 = vpack.c.bf16 %v221_v25, %v219_v24  ;;  %v218_v35 = vld [vmem:[#allocation2 + $0x380] sm:$0xff]  ;;  %v223_v38 = vld [vmem:[#allocation2 + $0x3a8] sm:$0xff]  ;;  %v225_v40 = vld [vmem:[#allocation2 + $0x3b8] sm:$0xff] }
  0xa1   :  { %v825_v24 = vld [vmem:[#allocation5 + $0x168] sm:$0xff]  ;;  %v827_v25 = vld [vmem:[#allocation5 + $0x178] sm:$0xff] }
  0xa2   :  { %466 = vmatmul.mubr.f32.gmra.mrb[2].mxu0 %v97_v49  ;;  %v207_v49 = vld [vmem:[#allocation2 + $0x328] sm:$0xff]  ;;  %1982 = vmatprep.subr.bf16.mxu1 %v2839_v43  ;;  %v2887_v29 = vpack.c.bf16 %v827_v25, %v825_v24 }
  0xa3   :  { %1772 = vmatpush1.bf16.msra.mxu0 %v1771_v48  ;;  %536 = vmatprep.mubr.f32.mxu0 %v91_v53  ;;  %v794_v48 = vld [vmem:[#allocation5 + $0x70] sm:$0xff]  ;;  %v799_v53 = vld [vmem:[#allocation5 + $0x98] sm:$0xff] }
  0xa4   :  { %1774 = vmatprep.subr.bf16.mxu0 %v1773_v50  ;;  %v209_v50 = vld [vmem:[#allocation2 + $0x338] sm:$0xff]  ;;  %v2842_v51 = vpack.c.bf16 %v794_v48, %v792_v44  ;;  %v2845_v55 = vpack.c.bf16 %v799_v53, %v797_v52  ;;  %v815_v44 = vld [vmem:[#allocation5 + $0x118] sm:$0xff]  ;;  %v1817_v48 = vpack.c.bf16 %v225_v40, %v223_v38  ;;  %v814_v52 = vld [vmem:[#allocation5 + $0x110] sm:$0xff] }
  0xa5   :  { %v227_v53 = vld [vmem:[#allocation2 + $0x3c8] sm:$0xff]  ;;  %v826_v38 = vld [vmem:[#allocation5 + $0x170] sm:$0xff] }
  0xa6   :  { %1984 = vmatpush1.bf16.msra.mxu1 %v2842_v51 }
  0xa7   :  { %1776 = vmatpush1.bf16.msra.mxu0 %v1775_v56  ;;  %v796_v56 = vld [vmem:[#allocation5 + $0x80] sm:$0xff]  ;;  %1986 = vmatprep.subr.bf16.mxu1 %v2845_v55 }
  0xa8   :  { %1778 = vmatprep.subr.bf16.mxu0 %v1777_v57  ;;  %v1801_v57 = vpack.c.bf16 %v209_v50, %v207_v49  ;;  %v222_v49 = vld [vmem:[#allocation2 + $0x3a0] sm:$0xff]  ;;  %v224_v50 = vld [vmem:[#allocation2 + $0x3b0] sm:$0xff] }
  0xa9   :  { %v1819_v59 = vpack.c.bf16 %v224_v50, %v222_v49 }
  0xab   :  { %1780 = vmatpush1.bf16.msra.mxu0 %v1779_v62  ;;  %v213_v62 = vld [vmem:[#allocation2 + $0x358] sm:$0xff] }
  0xac   :  { %1782 = vmatprep.subr.bf16.mxu0 %v1781_v63  ;;  %v2848_v63 = vpack.c.bf16 %v798_v60, %v796_v56  ;;  %v1805_v5 = vpack.c.bf16 %v213_v62, %v211_v61  ;;  %v2872_v56 = vpack.c.bf16 %v814_v52, %v812_v47  ;;  %v816_v61 = vld [vmem:[#allocation5 + $0x120] sm:$0xff] }
  0xad   :  { %v240_v52 = vld [vmem:[#allocation2 + $0x430] sm:$0xff] }
  0xae   :  { %1988 = vmatpush1.bf16.msra.mxu1 %v2848_v63 }
  0xaf   :  { %1784 = vmatpush1.bf16.msra.mxu0 %v1783_v6  ;;  %v210_v6 = vld [vmem:[#allocation2 + $0x340] sm:$0xff]  ;;  %1990 = vmatprep.subr.bf16.mxu1 %v2851_v3 }
  0xb0   :  { %1786 = vmatprep.subr.bf16.mxu0 %v1785_v9  ;;  %v802_v9 = vld [vmem:[#allocation5 + $0xb0] sm:$0xff]  ;;  %v1807_v16 = vpack.c.bf16 %v212_v8, %v210_v6  ;;  %v821_v8 = vld [vmem:[#allocation5 + $0x148] sm:$0xff] }
  0xb1   :  { %v2854_v12 = vpack.c.bf16 %v802_v9, %v800_v4  ;;  %v231_v4 = vld [vmem:[#allocation2 + $0x3e8] sm:$0xff] }
  0xb2   :  { %v823_v9 = vld [vmem:[#allocation5 + $0x158] sm:$0xff] }
  0xb3   :  { %1788 = vmatpush1.bf16.msra.mxu0 %v1787_v18  ;;  %1992 = vmatpush1.bf16.msra.mxu1 %v2854_v12  ;;  %v804_v18 = vld [vmem:[#allocation5 + $0xc0] sm:$0xff]  ;;  %v2881_v11 = vpack.c.bf16 %v823_v9, %v821_v8 }
  0xb4   :  { %1790 = vmatprep.subr.bf16.mxu0 %v1789_v21  ;;  %v214_v21 = vld [vmem:[#allocation2 + $0x360] sm:$0xff]  ;;  %1994 = vmatprep.subr.bf16.mxu1 %v2857_v17  ;;  %v2860_v26 = vpack.c.bf16 %v806_v23, %v804_v18  ;;  %v232_v18 = vld [vmem:[#allocation2 + $0x3f0] sm:$0xff] }
  0xb5   :  { %v832_v8 = vld [vmem:[#allocation5 + $0x1a0] sm:$0xff] }
  0xb7   :  { %1792 = vmatpush1.bf16.msra.mxu0 %v1791_v30  ;;  %v1811_v30 = vpack.c.bf16 %v216_v22, %v214_v21  ;;  %1996 = vmatpush1.bf16.msra.mxu1 %v2860_v26  ;;  %v235_v21 = vld [vmem:[#allocation2 + $0x408] sm:$0xff]  ;;  %v237_v22 = vld [vmem:[#allocation2 + $0x418] sm:$0xff] }
  0xb8   :  { %1794 = vmatprep.subr.bf16.mxu0 %v1793_v33  ;;  %v808_v33 = vld [vmem:[#allocation5 + $0xe0] sm:$0xff]  ;;  %1998 = vmatprep.subr.bf16.mxu1 %v2863_v32 }
  0xb9   :  { %v2866_v41 = vpack.c.bf16 %v810_v37, %v808_v33  ;;  %v234_v33 = vld [vmem:[#allocation2 + $0x400] sm:$0xff]  ;;  %v824_v37 = vld [vmem:[#allocation5 + $0x160] sm:$0xff] }
  0xba   :  { %v2890_v40 = vpack.c.bf16 %v826_v38, %v824_v37  ;;  %v838_v37 = vld [vmem:[#allocation5 + $0x1d0] sm:$0xff] }
  0xbb   :  { %1796 = vmatpush1.bf16.msra.mxu0 %v1795_v42  ;;  %v813_v42 = vld [vmem:[#allocation5 + $0x108] sm:$0xff]  ;;  %2000 = vmatpush1.bf16.msra.mxu1 %v2866_v41 }
  0xbc   :  { %1798 = vmatprep.subr.bf16.mxu0 %v1797_v45  ;;  %v1815_v45 = vpack.c.bf16 %v220_v36, %v218_v35  ;;  %v2869_v46 = vpack.c.bf16 %v815_v44, %v813_v42  ;;  %v239_v35 = vld [vmem:[#allocation2 + $0x428] sm:$0xff]  ;;  %v241_v36 = vld [vmem:[#allocation2 + $0x438] sm:$0xff] }
  0xbd   :  { %v829_v42 = vld [vmem:[#allocation5 + $0x188] sm:$0xff]  ;;  %v831_v44 = vld [vmem:[#allocation5 + $0x198] sm:$0xff]  ;;  %v1833_v50 = vpack.c.bf16 %v241_v36, %v239_v35 }
  0xbe   :  { %2002 = vmatprep.subr.bf16.mxu1 %v2869_v46  ;;  %v2895_v49 = vpack.c.bf16 %v831_v44, %v829_v42  ;;  %v251_v35 = vld [vmem:[#allocation2 + $0x488] sm:$0xff]  ;;  %v253_v36 = vld [vmem:[#allocation2 + $0x498] sm:$0xff] }
  0xbf   :  { %1800 = vmatpush1.bf16.msra.mxu0 %v1799_v54  ;;  %v229_v54 = vld [vmem:[#allocation2 + $0x3d8] sm:$0xff]  ;;  %2004 = vmatpush1.bf16.msra.mxu1 %v2872_v56  ;;  %v843_v44 = vld [vmem:[#allocation5 + $0x1f8] sm:$0xff] }
  0xc0   :  { %1802 = vmatprep.subr.bf16.mxu0 %v1801_v57  ;;  %v817_v57 = vld [vmem:[#allocation5 + $0x128] sm:$0xff]  ;;  %v1821_v62 = vpack.c.bf16 %v229_v54, %v227_v53  ;;  %v243_v53 = vld [vmem:[#allocation2 + $0x448] sm:$0xff]  ;;  %v100_v54 = vld [vmem:[%s3283_s0 + $0x60] sm:$0xff] }
  0xc1   :  { %v2875_v60 = vpack.c.bf16 %v819_v58, %v817_v57  ;;  %v245_v57 = vld [vmem:[#allocation2 + $0x458] sm:$0xff]  ;;  %v828_v58 = vld [vmem:[#allocation5 + $0x180] sm:$0xff] }
  0xc2   :  { %v1837_v9 = vpack.c.bf16 %v245_v57, %v243_v53  ;;  %v841_v42 = vld [vmem:[#allocation5 + $0x1e8] sm:$0xff]  ;;  %v252_v53 = vld [vmem:[#allocation2 + $0x490] sm:$0xff]  ;;  %v255_v57 = vld [vmem:[#allocation2 + $0x4a8] sm:$0xff] }
  0xc3   :  { %1804 = vmatpush1.bf16.msra.mxu0 %v1803_v2  ;;  %v818_v2 = vld [vmem:[#allocation5 + $0x130] sm:$0xff]  ;;  %2006 = vmatprep.subr.bf16.mxu1 %v2875_v60 }
  0xc4   :  { %1806 = vmatprep.subr.bf16.mxu0 %v1805_v5  ;;  %v233_v5 = vld [vmem:[#allocation2 + $0x3f8] sm:$0xff]  ;;  %v2878_v6 = vpack.c.bf16 %v818_v2, %v816_v61  ;;  %v242_v2 = vld [vmem:[#allocation2 + $0x440] sm:$0xff] }
  0xc5   :  { %v1825_v14 = vpack.c.bf16 %v233_v5, %v231_v4  ;;  %v99_v4 = vld [vmem:[%s3283_s0 + $0x58] sm:$0xff] }
  0xc6   :  { %2008 = vmatpush1.bf16.msra.mxu1 %v2878_v6 }
  0xc7   :  { %1808 = vmatpush1.bf16.msra.mxu0 %v1807_v16  ;;  %v230_v16 = vld [vmem:[#allocation2 + $0x3e0] sm:$0xff]  ;;  %2010 = vmatprep.subr.bf16.mxu1 %v2881_v11 }
  0xc8   :  { %1810 = vmatprep.subr.bf16.mxu0 %v1809_v20  ;;  %v822_v20 = vld [vmem:[#allocation5 + $0x150] sm:$0xff]  ;;  %v1827_v28 = vpack.c.bf16 %v232_v18, %v230_v16  ;;  %v247_v16 = vld [vmem:[#allocation2 + $0x468] sm:$0xff]  ;;  %v249_v18 = vld [vmem:[#allocation2 + $0x478] sm:$0xff] }
  0xc9   :  { %v2884_v23 = vpack.c.bf16 %v822_v20, %v820_v13  ;;  %v93_v13 = vld [vmem:[%s3283_s0 + $0x28] sm:$0xff] }
  0xcb   :  { %1812 = vmatpush1.bf16.msra.mxu0 %v1811_v30  ;;  %2012 = vmatpush1.bf16.msra.mxu1 %v2884_v23  ;;  %v1829_v30 = vpack.c.bf16 %v237_v22, %v235_v21  ;;  %v837_v21 = vld [vmem:[#allocation5 + $0x1c8] sm:$0xff]  ;;  %v839_v22 = vld [vmem:[#allocation5 + $0x1d8] sm:$0xff] }
  0xcc   :  { %1814 = vmatprep.subr.bf16.mxu0 %v1813_v34  ;;  %v236_v34 = vld [vmem:[#allocation2 + $0x410] sm:$0xff]  ;;  %2014 = vmatprep.subr.bf16.mxu1 %v2887_v29  ;;  %v2916_v25 = vpack.c.bf16 %v839_v22, %v837_v21  ;;  %v265_v21 = vld [vmem:[#allocation2 + $0x4f8] sm:$0xff] }
  0xcd   :  { %v1831_v47 = vpack.c.bf16 %v236_v34, %v234_v33  ;;  %v246_v33 = vld [vmem:[#allocation2 + $0x460] sm:$0xff]  ;;  %v248_v34 = vld [vmem:[#allocation2 + $0x470] sm:$0xff] }
  0xcf   :  { %1816 = vmatpush1.bf16.msra.mxu0 %v1815_v45  ;;  %v90_v45 = vld [vmem:[%s3283_s0 + $0x10] sm:$0xff]  ;;  %2016 = vmatpush1.bf16.msra.mxu1 %v2890_v40 }
  0xd0   :  { %1818 = vmatprep.subr.bf16.mxu0 %v1817_v48  ;;  %v238_v48 = vld [vmem:[#allocation2 + $0x420] sm:$0xff]  ;;  %2018 = vmatprep.subr.bf16.mxu1 %v2895_v49 }
  0xd1   :  { %v1835_v1 = vpack.c.bf16 %v240_v52, %v238_v48  ;;  %v840_v48 = vld [vmem:[#allocation5 + $0x1e0] sm:$0xff]  ;;  %v250_v52 = vld [vmem:[#allocation2 + $0x480] sm:$0xff] }
  0xd3   :  { %1820 = vmatpush1.bf16.msra.mxu0 %v1819_v59  ;;  %v830_v59 = vld [vmem:[#allocation5 + $0x190] sm:$0xff] }
  0xd4   :  { %1822 = vmatprep.subr.bf16.mxu0 %v1821_v62  ;;  %v2902_v61 = vpack.c.bf16 %v830_v59, %v828_v58  ;;  %v833_v62 = vld [vmem:[#allocation5 + $0x1a8] sm:$0xff] }
  0xd5   :  { %v2907_v5 = vpack.c.bf16 %v835_v0, %v833_v62  ;;  %v257_v58 = vld [vmem:[#allocation2 + $0x4b8] sm:$0xff]  ;;  %v1847_v62 = vpack.c.bf16 %v252_v53, %v250_v52  ;;  %v2693_v0 = vmov 0.0   ;;  %v270_v52 = vld [vmem:[#allocation2 + $0x520] sm:$0xff]  ;;  %v272_v53 = vld [vmem:[#allocation2 + $0x530] sm:$0xff] }
  0xd6   :  { %2020 = vmatpush1.bf16.msra.mxu1 %v2902_v61  ;;  %908 = vmatprep.mubr.f32.mxu1 %v2693_v0 }
  0xd7   :  { %1824 = vmatpush1.bf16.msra.mxu0 %v1823_v10  ;;  %v244_v10 = vld [vmem:[#allocation2 + $0x450] sm:$0xff]  ;;  %2022 = vmatprep.subr.bf16.mxu1 %v2907_v5 }
  0xd8   :  { %1826 = vmatprep.subr.bf16.mxu0 %v1825_v14  ;;  %v834_v14 = vld [vmem:[#allocation5 + $0x1b0] sm:$0xff]  ;;  %v1839_v24 = vpack.c.bf16 %v244_v10, %v242_v2 }
  0xd9   :  { %v2914_v20 = vpack.c.bf16 %v834_v14, %v832_v8  ;;  %v254_v2 = vld [vmem:[#allocation2 + $0x4a0] sm:$0xff]  ;;  %v259_v8 = vld [vmem:[#allocation2 + $0x4c8] sm:$0xff] }
  0xda   :  { %v258_v14 = vld [vmem:[#allocation2 + $0x4c0] sm:$0xff] }
  0xdb   :  { %1828 = vmatpush1.bf16.msra.mxu0 %v1827_v28  ;;  %v836_v28 = vld [vmem:[#allocation5 + $0x1c0] sm:$0xff]  ;;  %2024 = vmatpush1.bf16.msra.mxu1 %v2914_v20 }
  0xdc   :  { %1830 = vmatprep.subr.bf16.mxu0 %v1829_v30  ;;  %v1841_v30 = vpack.c.bf16 %v249_v18, %v247_v16  ;;  %2026 = vmatprep.subr.bf16.mxu1 %v2916_v25  ;;  %v2920_v38 = vpack.c.bf16 %v838_v37, %v836_v28  ;;  %v260_v16 = vld [vmem:[#allocation2 + $0x4d0] sm:$0xff]  ;;  %v263_v18 = vld [vmem:[#allocation2 + $0x4e8] sm:$0xff]  ;;  %v262_v28 = vld [vmem:[#allocation2 + $0x4e0] sm:$0xff] }
  0xdd   :  { %v1855_v22 = vpack.c.bf16 %v260_v16, %v258_v14  ;;  %v266_v37 = vld [vmem:[#allocation2 + $0x500] sm:$0xff]  ;;  %v280_v14 = vld [vmem:[#allocation2 + $0x570] sm:$0xff]  ;;  %v283_v16 = vld [vmem:[#allocation2 + $0x588] sm:$0xff] }
  0xde   :  { %537 = vmatmul.mubr.f32.vlgmr.msra.gmra.mrb[0].mxu0 %v90_v45  ;;  %v1843_v45 = vpack.c.bf16 %v248_v34, %v246_v33  ;;  %v267_v33 = vld [vmem:[#allocation2 + $0x508] sm:$0xff]  ;;  %v269_v34 = vld [vmem:[#allocation2 + $0x518] sm:$0xff] }
  0xdf   :  { %1832 = vmatpush1.bf16.msra.mxu0 %v1831_v47  ;;  %542 = vmatprep.mubr.f32.mxu0 %v100_v54  ;;  %v2922_v47 = vpack.c.bf16 %v843_v44, %v841_v42  ;;  %v842_v54 = vld [vmem:[#allocation5 + $0x1f0] sm:$0xff]  ;;  %v268_v42 = vld [vmem:[#allocation2 + $0x510] sm:$0xff]  ;;  %v271_v44 = vld [vmem:[#allocation2 + $0x528] sm:$0xff] }
  0xe0   :  { %1834 = vmatprep.subr.bf16.mxu0 %v1833_v50  ;;  %v1845_v50 = vpack.c.bf16 %v253_v36, %v251_v35  ;;  %2028 = vmatpush1.bf16.msra.mxu1 %v2920_v38  ;;  %v2926_v59 = vpack.c.bf16 %v842_v54, %v840_v48  ;;  %v1861_v36 = vpack.c.bf16 %v269_v34, %v267_v33  ;;  %v275_v54 = vld [vmem:[#allocation2 + $0x548] sm:$0xff]  ;;  %v289_v33 = vld [vmem:[#allocation2 + $0x5b8] sm:$0xff] }
  0xe1   :  { %2030 = vmatprep.subr.bf16.mxu1 %v2922_v47  ;;  %v1863_v48 = vpack.c.bf16 %v268_v42, %v266_v37  ;;  %v288_v37 = vld [vmem:[#allocation2 + $0x5b0] sm:$0xff]  ;;  %v291_v42 = vld [vmem:[#allocation2 + $0x5c8] sm:$0xff] }
  0xe2   :  { %543 = vmatmul.mubr.f32.gmra.mrb[2].mxu0 %v99_v4  ;;  %v256_v4 = vld [vmem:[#allocation2 + $0x4b0] sm:$0xff] }
  0xe3   :  { %1836 = vmatpush1.bf16.msra.mxu0 %v1835_v1  ;;  %613 = vmatprep.mubr.f32.mxu0 %v93_v13  ;;  %v1849_v1 = vpack.c.bf16 %v257_v58, %v255_v57  ;;  %v1851_v10 = vpack.c.bf16 %v256_v4, %v254_v2  ;;  %v277_v57 = vld [vmem:[#allocation2 + $0x558] sm:$0xff]  ;;  %v1867_v58 = vpack.c.bf16 %v272_v53, %v270_v52  ;;  %v276_v2 = vld [vmem:[#allocation2 + $0x550] sm:$0xff]  ;;  %v279_v4 = vld [vmem:[#allocation2 + $0x568] sm:$0xff] }
  0xe4   :  { %1838 = vmatprep.subr.bf16.mxu0 %v1837_v9  ;;  %2032 = vmatpush1.bf16.msra.mxu1 %v2926_v59  ;;  %v261_v9 = vld [vmem:[#allocation2 + $0x4d8] sm:$0xff]  ;;  %v292_v52 = vld [vmem:[#allocation2 + $0x5d0] sm:$0xff]  ;;  %v295_v53 = vld [vmem:[#allocation2 + $0x5e8] sm:$0xff] }
  0xe5   :  { %2034 = vmatprep.subr.bf16.mxu1 %v2821_v7  ;;  %v1853_v13 = vpack.c.bf16 %v261_v9, %v259_v8  ;;  %v281_v8 = vld [vmem:[#allocation2 + $0x578] sm:$0xff] }
  0xe7   :  { %1840 = vmatpush1.bf16.msra.mxu0 %v1839_v24  ;;  %909 = vmatmul.mubr.f32.vlgmr.msra.gmra.mrb[0].mxu1 %v2693_v0  ;;  %v1857_v24 = vpack.c.bf16 %v265_v21, %v263_v18  ;;  %v285_v18 = vld [vmem:[#allocation2 + $0x598] sm:$0xff] }
  0xe8   :  { %1842 = vmatprep.subr.bf16.mxu0 %v1841_v30  ;;  %2036 = vmatpush1.bf16.msra.mxu1 %v2824_v15  ;;  %v264_v30 = vld [vmem:[#allocation2 + $0x4f0] sm:$0xff] }
  0xe9   :  { %2038 = vmatprep.subr.bf16.mxu1 %v2827_v19  ;;  %v1859_v35 = vpack.c.bf16 %v264_v30, %v262_v28  ;;  %v284_v28 = vld [vmem:[#allocation2 + $0x590] sm:$0xff]  ;;  %v287_v30 = vld [vmem:[#allocation2 + $0x5a8] sm:$0xff] }
  0xeb   :  { %1844 = vmatpush1.bf16.msra.mxu0 %v1843_v45  ;;  %v273_v45 = vld [vmem:[#allocation2 + $0x538] sm:$0xff] }
  0xec   :  { %1846 = vmatprep.subr.bf16.mxu0 %v1845_v50  ;;  %2040 = vmatpush1.bf16.msra.mxu1 %v2830_v27  ;;  %v1865_v50 = vpack.c.bf16 %v273_v45, %v271_v44  ;;  %v293_v44 = vld [vmem:[#allocation2 + $0x5d8] sm:$0xff] }
  0xed   :  { %2042 = vmatprep.subr.bf16.mxu1 %v2833_v31 }
  0xef   :  { %1848 = vmatpush1.bf16.msra.mxu0 %v1847_v62  ;;  %v1869_v62 = vpack.c.bf16 %v277_v57, %v275_v54  ;;  %v297_v54 = vld [vmem:[#allocation2 + $0x5f8] sm:$0xff] }
  0xf0   :  { %1850 = vmatprep.subr.bf16.mxu0 %v1849_v1  ;;  %2044 = vmatpush1.bf16.msra.mxu1 %v2836_v39  ;;  %v274_v1 = vld [vmem:[#allocation2 + $0x540] sm:$0xff] }
  0xf1   :  { %2046 = vmatprep.subr.bf16.mxu1 %v2839_v43  ;;  %v1871_v9 = vpack.c.bf16 %v276_v2, %v274_v1  ;;  %v296_v1 = vld [vmem:[#allocation2 + $0x5f0] sm:$0xff]  ;;  %v299_v2 = vld [vmem:[#allocation2 + $0x608] sm:$0xff] }
  0xf3   :  { %1852 = vmatpush1.bf16.msra.mxu0 %v1851_v10  ;;  %v1873_v10 = vpack.c.bf16 %v281_v8, %v279_v4  ;;  %v301_v4 = vld [vmem:[#allocation2 + $0x618] sm:$0xff] }
  0xf4   :  { %1854 = vmatprep.subr.bf16.mxu0 %v1853_v13  ;;  %2048 = vmatpush1.bf16.msra.mxu1 %v2842_v51  ;;  %v278_v13 = vld [vmem:[#allocation2 + $0x560] sm:$0xff] }
  0xf5   :  { %2050 = vmatprep.subr.bf16.mxu1 %v2845_v55  ;;  %v1875_v21 = vpack.c.bf16 %v280_v14, %v278_v13  ;;  %v300_v13 = vld [vmem:[#allocation2 + $0x610] sm:$0xff]  ;;  %v303_v14 = vld [vmem:[#allocation2 + $0x628] sm:$0xff] }
  0xf7   :  { %1856 = vmatpush1.bf16.msra.mxu0 %v1855_v22  ;;  %v1877_v22 = vpack.c.bf16 %v285_v18, %v283_v16  ;;  %v305_v16 = vld [vmem:[#allocation2 + $0x638] sm:$0xff]  ;;  %v92_v18 = vld [vmem:[%s3283_s0 + $0x20] sm:$0xff] }
  0xf8   :  { %1858 = vmatprep.subr.bf16.mxu0 %v1857_v24  ;;  %2052 = vmatpush1.bf16.msra.mxu1 %v2848_v63  ;;  %v282_v24 = vld [vmem:[#allocation2 + $0x580] sm:$0xff] }
  0xf9   :  { %2054 = vmatprep.subr.bf16.mxu1 %v2851_v3  ;;  %v1879_v34 = vpack.c.bf16 %v284_v28, %v282_v24  ;;  %v302_v24 = vld [vmem:[#allocation2 + $0x620] sm:$0xff]  ;;  %v304_v28 = vld [vmem:[#allocation2 + $0x630] sm:$0xff] }
  0xfb   :  { %1860 = vmatpush1.bf16.msra.mxu0 %v1859_v35  ;;  %v1881_v35 = vpack.c.bf16 %v289_v33, %v287_v30  ;;  %v102_v30 = vld [vmem:[%s3283_s0 + $0x70] sm:$0xff]  ;;  %v307_v33 = vld [vmem:[#allocation2 + $0x648] sm:$0xff] }
  0xfc   :  { %1862 = vmatprep.subr.bf16.mxu0 %v1861_v36  ;;  %2056 = vmatpush1.bf16.msra.mxu1 %v2854_v12  ;;  %v286_v36 = vld [vmem:[#allocation2 + $0x5a0] sm:$0xff] }
  0xfd   :  { %2058 = vmatprep.subr.bf16.mxu1 %v2857_v17  ;;  %v1883_v45 = vpack.c.bf16 %v288_v37, %v286_v36  ;;  %v101_v36 = vld [vmem:[%s3283_s0 + $0x68] sm:$0xff] }
  0xff   :  { %1864 = vmatpush1.bf16.msra.mxu0 %v1863_v48  ;;  %v1885_v48 = vpack.c.bf16 %v293_v44, %v291_v42  ;;  %v306_v42 = vld [vmem:[#allocation2 + $0x640] sm:$0xff]  ;;  %v308_v44 = vld [vmem:[#allocation2 + $0x650] sm:$0xff] }
 0x100   :  { %1866 = vmatprep.subr.bf16.mxu0 %v1865_v50  ;;  %2060 = vmatpush1.bf16.msra.mxu1 %v2860_v26  ;;  %v290_v50 = vld [vmem:[#allocation2 + $0x5c0] sm:$0xff] }
 0x101   :  { %2062 = vmatprep.subr.bf16.mxu1 %v2863_v32  ;;  %v1887_v57 = vpack.c.bf16 %v292_v52, %v290_v50  ;;  %v313_v50 = vld [vmem:[#allocation2 + $0x678] sm:$0xff]  ;;  %v1903_v52 = vpack.c.bf16 %v308_v44, %v306_v42  ;;  %v326_v42 = vld [vmem:[#allocation2 + $0x6e0] sm:$0xff]  ;;  %v328_v44 = vld [vmem:[#allocation2 + $0x6f0] sm:$0xff] }
 0x103   :  { %1868 = vmatpush1.bf16.msra.mxu0 %v1867_v58  ;;  %v1889_v58 = vpack.c.bf16 %v297_v54, %v295_v53  ;;  %v310_v54 = vld [vmem:[#allocation2 + $0x660] sm:$0xff] }
 0x104   :  { %1870 = vmatprep.subr.bf16.mxu0 %v1869_v62  ;;  %2064 = vmatpush1.bf16.msra.mxu1 %v2866_v41  ;;  %v294_v62 = vld [vmem:[#allocation2 + $0x5e0] sm:$0xff] }
 0x105   :  { %2066 = vmatprep.subr.bf16.mxu1 %v2869_v46  ;;  %v1891_v8 = vpack.c.bf16 %v296_v1, %v294_v62  ;;  %v317_v62 = vld [vmem:[#allocation2 + $0x698] sm:$0xff] }
 0x107   :  { %1872 = vmatpush1.bf16.msra.mxu0 %v1871_v9  ;;  %v1893_v9 = vpack.c.bf16 %v301_v4, %v299_v2  ;;  %v314_v4 = vld [vmem:[#allocation2 + $0x680] sm:$0xff] }
 0x108   :  { %1874 = vmatprep.subr.bf16.mxu0 %v1873_v10  ;;  %2068 = vmatpush1.bf16.msra.mxu1 %v2872_v56  ;;  %v298_v10 = vld [vmem:[#allocation2 + $0x600] sm:$0xff] }
 0x109   :  { %2070 = vmatprep.subr.bf16.mxu1 %v2875_v60 }
 0x10b   :  { %1876 = vmatpush1.bf16.msra.mxu0 %v1875_v21  ;;  %v1895_v21 = vpack.c.bf16 %v300_v13, %v298_v10  ;;  %v321_v10 = vld [vmem:[#allocation2 + $0x6b8] sm:$0xff] }
 0x10c   :  { %1878 = vmatprep.subr.bf16.mxu0 %v1877_v22  ;;  %2072 = vmatpush1.bf16.msra.mxu1 %v2878_v6  ;;  %v1897_v22 = vpack.c.bf16 %v305_v16, %v303_v14  ;;  %v318_v16 = vld [vmem:[#allocation2 + $0x6a0] sm:$0xff] }
 0x10d   :  { %2074 = vmatprep.subr.bf16.mxu1 %v2881_v11 }
 0x10f   :  { %1880 = vmatpush1.bf16.msra.mxu0 %v1879_v34  ;;  %v309_v34 = vld [vmem:[#allocation2 + $0x658] sm:$0xff] }
 0x110   :  { %1882 = vmatprep.subr.bf16.mxu0 %v1881_v35  ;;  %2076 = vmatpush1.bf16.msra.mxu1 %v2884_v23  ;;  %v1899_v35 = vpack.c.bf16 %v304_v28, %v302_v24  ;;  %v1901_v37 = vpack.c.bf16 %v309_v34, %v307_v33  ;;  %v324_v33 = vld [vmem:[#allocation2 + $0x6d0] sm:$0xff]  ;;  %v327_v34 = vld [vmem:[#allocation2 + $0x6e8] sm:$0xff] }
 0x111   :  { %2078 = vmatprep.subr.bf16.mxu1 %v2887_v29 }
 0x113   :  { %1884 = vmatpush1.bf16.msra.mxu0 %v1883_v45  ;;  %v95_v45 = vld [vmem:[%s3283_s0 + $0x38] sm:$0xff] }
 0x114   :  { %1886 = vmatprep.subr.bf16.mxu0 %v1885_v48  ;;  %2080 = vmatpush1.bf16.msra.mxu1 %v2890_v40  ;;  %v311_v48 = vld [vmem:[#allocation2 + $0x668] sm:$0xff] }
 0x115   :  { %2082 = vmatprep.subr.bf16.mxu1 %v2895_v49  ;;  %v1905_v53 = vpack.c.bf16 %v313_v50, %v311_v48  ;;  %v333_v48 = vld [vmem:[#allocation2 + $0x718] sm:$0xff]  ;;  %v1923_v50 = vpack.c.bf16 %v328_v44, %v326_v42  ;;  %v348_v42 = vld [vmem:[#allocation2 + $0x790] sm:$0xff]  ;;  %v351_v44 = vld [vmem:[#allocation2 + $0x7a8] sm:$0xff] }
 0x117   :  { %1888 = vmatpush1.bf16.msra.mxu0 %v1887_v57  ;;  %v312_v57 = vld [vmem:[#allocation2 + $0x670] sm:$0xff] }
 0x118   :  { %1890 = vmatprep.subr.bf16.mxu0 %v1889_v58  ;;  %2084 = vmatpush1.bf16.msra.mxu1 %v2902_v61  ;;  %v315_v58 = vld [vmem:[#allocation2 + $0x688] sm:$0xff]  ;;  %v1907_v1 = vpack.c.bf16 %v312_v57, %v310_v54  ;;  %v332_v54 = vld [vmem:[#allocation2 + $0x710] sm:$0xff] }
 0x119   :  { %2086 = vmatprep.subr.bf16.mxu1 %v2907_v5  ;;  %v1909_v2 = vpack.c.bf16 %v317_v62, %v315_v58  ;;  %v335_v57 = vld [vmem:[#allocation2 + $0x728] sm:$0xff]  ;;  %v337_v58 = vld [vmem:[#allocation2 + $0x738] sm:$0xff] }
 0x11b   :  { %1892 = vmatpush1.bf16.msra.mxu0 %v1891_v8  ;;  %v316_v8 = vld [vmem:[#allocation2 + $0x690] sm:$0xff] }
 0x11c   :  { %1894 = vmatprep.subr.bf16.mxu0 %v1893_v9  ;;  %2088 = vmatpush1.bf16.msra.mxu1 %v2914_v20  ;;  %v319_v9 = vld [vmem:[#allocation2 + $0x6a8] sm:$0xff]  ;;  %v1911_v13 = vpack.c.bf16 %v316_v8, %v314_v4  ;;  %v336_v4 = vld [vmem:[#allocation2 + $0x730] sm:$0xff] }
 0x11d   :  { %2090 = vmatprep.subr.bf16.mxu1 %v2916_v25  ;;  %v1913_v14 = vpack.c.bf16 %v321_v10, %v319_v9  ;;  %v339_v8 = vld [vmem:[#allocation2 + $0x748] sm:$0xff]  ;;  %v341_v9 = vld [vmem:[#allocation2 + $0x758] sm:$0xff] }
 0x11e   :  { %614 = vmatmul.mubr.f32.vlgmr.msra.gmra.mrb[0].mxu0 %v92_v18  ;;  %v320_v18 = vld [vmem:[#allocation2 + $0x6b0] sm:$0xff] }
 0x11f   :  { %1896 = vmatpush1.bf16.msra.mxu0 %v1895_v21  ;;  %619 = vmatprep.mubr.f32.mxu0 %v102_v30  ;;  %v323_v21 = vld [vmem:[#allocation2 + $0x6c8] sm:$0xff]  ;;  %v1915_v24 = vpack.c.bf16 %v320_v18, %v318_v16  ;;  %v322_v30 = vld [vmem:[#allocation2 + $0x6c0] sm:$0xff]  ;;  %v340_v16 = vld [vmem:[#allocation2 + $0x750] sm:$0xff] }
 0x120   :  { %1898 = vmatprep.subr.bf16.mxu0 %v1897_v22  ;;  %2092 = vmatpush1.bf16.msra.mxu1 %v2920_v38  ;;  %v325_v22 = vld [vmem:[#allocation2 + $0x6d8] sm:$0xff]  ;;  %v343_v18 = vld [vmem:[#allocation2 + $0x768] sm:$0xff] }
 0x121   :  { %2094 = vmatprep.subr.bf16.mxu1 %v2922_v47  ;;  %v1917_v28 = vpack.c.bf16 %v325_v22, %v323_v21  ;;  %v345_v21 = vld [vmem:[#allocation2 + $0x778] sm:$0xff] }
 0x122   :  { %620 = vmatmul.mubr.f32.gmra.mrb[2].mxu0 %v101_v36  ;;  %v1919_v36 = vpack.c.bf16 %v324_v33, %v322_v30  ;;  %v344_v30 = vld [vmem:[#allocation2 + $0x770] sm:$0xff]  ;;  %v347_v33 = vld [vmem:[#allocation2 + $0x788] sm:$0xff] }
 0x123   :  { %1900 = vmatpush1.bf16.msra.mxu0 %v1899_v35  ;;  %690 = vmatprep.mubr.f32.mxu0 %v95_v45  ;;  %v329_v35 = vld [vmem:[#allocation2 + $0x6f8] sm:$0xff]  ;;  %v331_v45 = vld [vmem:[#allocation2 + $0x708] sm:$0xff] }
 0x124   :  { %1902 = vmatprep.subr.bf16.mxu0 %v1901_v37  ;;  %2096 = vmatpush1.bf16.msra.mxu1 %v2926_v59  ;;  %v1921_v37 = vpack.c.bf16 %v329_v35, %v327_v34  ;;  %v349_v34 = vld [vmem:[#allocation2 + $0x798] sm:$0xff] }
 0x125   :  { %2098 = vmatprep.subr.bf16.mxu1 %v2821_v7 }
 0x127   :  { %1904 = vmatpush1.bf16.msra.mxu0 %v1903_v52  ;;  %v1925_v52 = vpack.c.bf16 %v333_v48, %v331_v45  ;;  %v353_v45 = vld [vmem:[#allocation2 + $0x7b8] sm:$0xff] }
 0x128   :  { %1906 = vmatprep.subr.bf16.mxu0 %v1905_v53  ;;  %v330_v53 = vld [vmem:[#allocation2 + $0x700] sm:$0xff] }
 0x129   :  { %v1927_v62 = vpack.c.bf16 %v332_v54, %v330_v53  ;;  %v352_v53 = vld [vmem:[#allocation2 + $0x7b0] sm:$0xff]  ;;  %v355_v54 = vld [vmem:[#allocation2 + $0x7c8] sm:$0xff] }
 0x12b   :  { %1908 = vmatpush1.bf16.msra.mxu0 %v1907_v1  ;;  %v1929_v1 = vpack.c.bf16 %v337_v58, %v335_v57  ;;  %v357_v57 = vld [vmem:[#allocation2 + $0x7d8] sm:$0xff] }
 0x12c   :  { %1910 = vmatprep.subr.bf16.mxu0 %v1909_v2  ;;  %v334_v2 = vld [vmem:[#allocation2 + $0x720] sm:$0xff] }
 0x12d   :  { %v1931_v10 = vpack.c.bf16 %v336_v4, %v334_v2  ;;  %v356_v2 = vld [vmem:[#allocation2 + $0x7d0] sm:$0xff]  ;;  %v359_v4 = vld [vmem:[#allocation2 + $0x7e8] sm:$0xff] }
 0x12f   :  { %1912 = vmatpush1.bf16.msra.mxu0 %v1911_v13  ;;  %v1933_v13 = vpack.c.bf16 %v341_v9, %v339_v8  ;;  %v361_v8 = vld [vmem:[#allocation2 + $0x7f8] sm:$0xff] }
 0x130   :  { %1914 = vmatprep.subr.bf16.mxu0 %v1913_v14  ;;  %v338_v14 = vld [vmem:[#allocation2 + $0x740] sm:$0xff] }
 0x131   :  { %v1935_v22 = vpack.c.bf16 %v340_v16, %v338_v14  ;;  %v360_v14 = vld [vmem:[#allocation2 + $0x7f0] sm:$0xff]  ;;  %v363_v16 = vld [vmem:[#allocation2 + $0x808] sm:$0xff] }
 0x133   :  { %1916 = vmatpush1.bf16.msra.mxu0 %v1915_v24  ;;  %v1937_v24 = vpack.c.bf16 %v345_v21, %v343_v18  ;;  %v365_v18 = vld [vmem:[#allocation2 + $0x818] sm:$0xff] }
 0x134   :  { %1918 = vmatprep.subr.bf16.mxu0 %v1917_v28  ;;  %v342_v28 = vld [vmem:[#allocation2 + $0x760] sm:$0xff] }
 0x135   :  { %v1939_v35 = vpack.c.bf16 %v344_v30, %v342_v28  ;;  %v364_v28 = vld [vmem:[#allocation2 + $0x810] sm:$0xff]  ;;  %v367_v30 = vld [vmem:[#allocation2 + $0x828] sm:$0xff] }
 0x137   :  { %1920 = vmatpush1.bf16.msra.mxu0 %v1919_v36  ;;  %v1941_v36 = vpack.c.bf16 %v349_v34, %v347_v33  ;;  %v369_v33 = vld [vmem:[#allocation2 + $0x838] sm:$0xff]  ;;  %v94_v34 = vld [vmem:[%s3283_s0 + $0x30] sm:$0xff] }
 0x138   :  { %1922 = vmatprep.subr.bf16.mxu0 %v1921_v37  ;;  %v346_v37 = vld [vmem:[#allocation2 + $0x780] sm:$0xff] }
 0x139   :  { %v1943_v48 = vpack.c.bf16 %v348_v42, %v346_v37  ;;  %v366_v37 = vld [vmem:[#allocation2 + $0x820] sm:$0xff]  ;;  %v368_v42 = vld [vmem:[#allocation2 + $0x830] sm:$0xff] }
 0x13b   :  { %1924 = vmatpush1.bf16.msra.mxu0 %v1923_v50  ;;  %v1945_v50 = vpack.c.bf16 %v353_v45, %v351_v44  ;;  %v104_v44 = vld [vmem:[%s3283_s0 + $0x80] sm:$0xff]  ;;  %v371_v45 = vld [vmem:[#allocation2 + $0x848] sm:$0xff] }
 0x13c   :  { %1926 = vmatprep.subr.bf16.mxu0 %v1925_v52  ;;  %v350_v52 = vld [vmem:[#allocation2 + $0x7a0] sm:$0xff] }
 0x13d   :  { %v1947_v58 = vpack.c.bf16 %v352_v53, %v350_v52  ;;  %v103_v52 = vld [vmem:[%s3283_s0 + $0x78] sm:$0xff] }
 0x13f   :  { %1928 = vmatpush1.bf16.msra.mxu0 %v1927_v62  ;;  %v1949_v62 = vpack.c.bf16 %v357_v57, %v355_v54  ;;  %v370_v54 = vld [vmem:[#allocation2 + $0x840] sm:$0xff]  ;;  %v372_v57 = vld [vmem:[#allocation2 + $0x850] sm:$0xff] }
 0x140   :  { %1930 = vmatprep.subr.bf16.mxu0 %v1929_v1  ;;  %v354_v1 = vld [vmem:[#allocation2 + $0x7c0] sm:$0xff] }
 0x141   :  { %v1951_v9 = vpack.c.bf16 %v356_v2, %v354_v1  ;;  %v374_v1 = vld [vmem:[#allocation2 + $0x860] sm:$0xff]  ;;  %v96_v2 = vld [vmem:[%s3283_s0 + $0x40] sm:$0xff] }
 0x143   :  { %1932 = vmatpush1.bf16.msra.mxu0 %v1931_v10  ;;  %v1953_v10 = vpack.c.bf16 %v361_v8, %v359_v4  ;;  %v105_v4 = vld [vmem:[%s3283_s0 + $0x88] sm:$0xff]  ;;  %s2694_s0 = smov [#allocation11]  }
 0x144   :  { %1934 = vmatprep.subr.bf16.mxu0 %v1933_v13  ;;  %v358_v13 = vld [vmem:[#allocation2 + $0x7e0] sm:$0xff]  ;;  %s1646_s20 = sshll.u32 %s2694_s0, 4  ;;  %s1647_s20 = int_to_ptr.vmem [resolvable:$true] %s1646_s20 }
 0x145   :  { %v1955_v21 = vpack.c.bf16 %v360_v14, %v358_v13  ;;  %v376_v14 = vld [vmem:[#allocation7] sm:$0x3]  ;;  %s2654_s22 = scalar_lea.vmem %s1647_s20, 256  ;;  %p2659_p13 = scmp.lt.s32.totalorder %s1647_s20, %s1647_s20 }
 0x146   :  { %p2655_p12 = scmp.ne.s32.totalorder %s1647_s20, %s2654_s22  ;;  %p2660_p0 = scmp.lt.s32.totalorder %s2654_s22, %s2654_s22 }
 0x147   :  { %1936 = vmatpush1.bf16.msra.mxu0 %v1935_v22  ;;  %v1957_v22 = vpack.c.bf16 %v365_v18, %v363_v16 }
 0x148   :  { %1938 = vmatprep.subr.bf16.mxu0 %v1937_v24  ;;  %v362_v24 = vld [vmem:[#allocation2 + $0x800] sm:$0xff]  ;;  %p2661_p1 = por %p2660_p0, %p2659_p13 }
 0x14a   :  { %p2662_p2 = pnand %p2661_p1, %p2655_p12 }
 0x14b   :  { %1940 = vmatpush1.bf16.msra.mxu0 %v1939_v35  ;;  %v1959_v35 = vpack.c.bf16 %v364_v28, %v362_v24 }
 0x14c   :  { %1942 = vmatprep.subr.bf16.mxu0 %v1941_v36  ;;  %v1961_v36 = vpack.c.bf16 %v369_v33, %v367_v30 }
 0x14f   :  { %1944 = vmatpush1.bf16.msra.mxu0 %v1943_v48  ;;  %v373_v48 = vld [vmem:[#allocation2 + $0x858] sm:$0xff] }
 0x150   :  { %1946 = vmatprep.subr.bf16.mxu0 %v1945_v50  ;;  %v1963_v50 = vpack.c.bf16 %v368_v42, %v366_v37  ;;  %v1965_v53 = vpack.c.bf16 %v373_v48, %v371_v45 }
 0x153   :  { %1948 = vmatpush1.bf16.msra.mxu0 %v1947_v58  ;;  %v1967_v58 = vpack.c.bf16 %v372_v57, %v370_v54 }
 0x154   :  { %1950 = vmatprep.subr.bf16.mxu0 %v1949_v62  ;;  %v375_v62 = vld [vmem:[#allocation2 + $0x868] sm:$0xff] }
 0x157   :  { %1952 = vmatpush1.bf16.msra.mxu0 %v1951_v9  ;;  %v378_v9 = vlaneseq }
 0x158   :  { %1954 = vmatprep.subr.bf16.mxu0 %v1953_v10 }
 0x159   :  { %v379_v10 = vshrl.u32 %v378_v9, 7 }
 0x15b   :  { %1956 = vmatpush1.bf16.msra.mxu0 %v1955_v21  ;;  %v380_v13 = vsub.s32 0, %v379_v10  ;;  %v384_v16 = vsub.s32 1, %v379_v10 }
 0x15c   :  { %1958 = vmatprep.subr.bf16.mxu0 %v1957_v22 }
 0x15d   :  { %v381_v18 = vrot.slane %v376_v14, %v380_v13  ;;  %v385_v21 = vrot.slane %v376_v14, %v384_v16 }
 0x15e   :  { %691 = vmatmul.mubr.f32.vlgmr.msra.gmra.mrb[0].mxu0 %v94_v34 }
 0x15f   :  { %1960 = vmatpush1.bf16.msra.mxu0 %v1959_v35  ;;  %696 = vmatprep.mubr.f32.mxu0 %v104_v44 }
 0x160   :  { %1962 = vmatprep.subr.bf16.mxu0 %v1961_v36 }
 0x162   :  { %697 = vmatmul.mubr.f32.gmra.mrb[2].mxu0 %v103_v52 }
 0x163   :  { %1964 = vmatpush1.bf16.msra.mxu0 %v1963_v50  ;;  %767 = vmatprep.mubr.f32.mxu0 %v2693_v0 }
 0x164   :  { %1966 = vmatprep.subr.bf16.mxu0 %v1965_v53 }
 0x167   :  { %1968 = vmatpush1.bf16.msra.mxu0 %v1967_v58 }
 0x168   :  { %715 = vmatprep.subr.mxu0 %v375_v62 }
 0x16b   :  { %716 = vmatpush1.msra.mxu0 %v374_v1 }
 0x16c   :  { %1660 = vmatmul.mubr.msk.f32.vlgmr.msra.gmra.mrb[0].mxu0 %vm388_vm0, %v96_v2  ;;  %2290 = vmatprep.subr.bf16.mxu0 %v2821_v7 }
 0x16d   :  { %773 = vmatprep.mubr.f32.mxu0 %v2693_v0  ;;  %2292 = vmatpush1.bf16.msra.mxu0 %v2824_v15 }
 0x16e   :  { %2294 = vmatprep.subr.bf16.mxu0 %v2827_v19 }
 0x170   :  { %1661 = vmatmul.mubr.msk.f32.gmra.mrb[2].mxu0 %vm388_vm0, %v105_v4 }
 0x171   :  { %2296 = vmatpush1.bf16.msra.mxu0 %v2830_v27 }
 0x172   :  { %2298 = vmatprep.subr.bf16.mxu0 %v2833_v31 }
 0x175   :  { %2300 = vmatpush1.bf16.msra.mxu0 %v2836_v39 }
 0x176   :  { %2302 = vmatprep.subr.bf16.mxu0 %v2839_v43 }
 0x179   :  { %2304 = vmatpush1.bf16.msra.mxu0 %v2842_v51 }
 0x17a   :  { %2306 = vmatprep.subr.bf16.mxu0 %v2845_v55 }
 0x17d   :  { %2308 = vmatpush1.bf16.msra.mxu0 %v2848_v63 }
 0x17e   :  { %2310 = vmatprep.subr.bf16.mxu0 %v2851_v3 }
 0x181   :  { %2312 = vmatpush1.bf16.msra.mxu0 %v2854_v12 }
 0x182   :  { %2314 = vmatprep.subr.bf16.mxu0 %v2857_v17 }
 0x185   :  { %2316 = vmatpush1.bf16.msra.mxu0 %v2860_v26 }
 0x186   :  { %2318 = vmatprep.subr.bf16.mxu0 %v2863_v32 }
 0x189   :  { %2320 = vmatpush1.bf16.msra.mxu0 %v2866_v41 }
 0x18a   :  { %2322 = vmatprep.subr.bf16.mxu0 %v2869_v46 }
 0x18d   :  { %2324 = vmatpush1.bf16.msra.mxu0 %v2872_v56 }
 0x18e   :  { %2326 = vmatprep.subr.bf16.mxu0 %v2875_v60 }
 0x191   :  { %2328 = vmatpush1.bf16.msra.mxu0 %v2878_v6 }
 0x192   :  { %2330 = vmatprep.subr.bf16.mxu0 %v2881_v11 }
 0x195   :  { %2332 = vmatpush1.bf16.msra.mxu0 %v2884_v23 }
 0x196   :  { %2334 = vmatprep.subr.bf16.mxu0 %v2887_v29 }
 0x199   :  { %2336 = vmatpush1.bf16.msra.mxu0 %v2890_v40 }
 0x19a   :  { %2338 = vmatprep.subr.bf16.mxu0 %v2895_v49 }
 0x19d   :  { %2340 = vmatpush1.bf16.msra.mxu0 %v2902_v61 }
 0x19e   :  { %2342 = vmatprep.subr.bf16.mxu0 %v2907_v5 }
 0x1a1   :  { %2344 = vmatpush1.bf16.msra.mxu0 %v2914_v20 }
 0x1a2   :  { %2346 = vmatprep.subr.bf16.mxu0 %v2916_v25 }
 0x1a5   :  { %2348 = vmatpush1.bf16.msra.mxu0 %v2920_v38 }
 0x1a6   :  { %2350 = vmatprep.subr.bf16.mxu0 %v2922_v47 }
 0x1a9   :  { %2352 = vmatpush1.bf16.msra.mxu0 %v2926_v59 }
 0x1aa   :  { %2418 = vmatprep.subr.bf16.mxu0 %v2821_v7 }
 0x1ba   :  { %v910_v0 = vpop.f32.mrb[0].mxu1 }
 0x1bb   :  { %v912_v8 = vpop.f32.mrb[1].mxu1 }
 0x23f   :  { %v769_v22 = vpop.f32.mrb[0].mxu0 }
 0x240   :  { %v3026_v24 = vadd.f32 %v769_v22, %v381_v18  ;;  %v771_v28 = vpop.f32.mrb[1].mxu0 }
 0x241   :  { %v3028_v30 = vadd.f32 %v771_v28, %v385_v21 }
 0x242   :  { %v3031_v33 = vadd.f32 %v3026_v24, %v910_v0 }
 0x243   :  { %v3034_v34 = vadd.f32 %v3028_v30, %v912_v8  ;;  %v775_v35 = vpop.f32.mrb[2].mxu0 }
 0x244   :  { %v3036_v36 = vadd.f32 %v775_v35, %v381_v18  ;;  %v777_v37 = vpop.f32.mrb[3].mxu0  ;;  %v917_v45 = vmax.f32 %v3031_v33, 0.0 }
 0x245   :  { %v918_v42 = vmax.f32 %v3034_v34, 0.0  ;;  %v3039_v44 = vadd.f32 %v777_v37, %v385_v21 }
 0x247   :  { %983 = vmatprep.mubr.f32.mxu1 %v918_v42 }
 0x248   :  { %984 = vmatmul.mubr.f32.vlgmr.msra.gmra.mrb[2].mxu1 %v917_v45 }
 0x249   :  { %2100 = vmatpush1.bf16.msra.mxu1 %v2824_v15 }
 0x24a   :  { %2102 = vmatprep.subr.bf16.mxu1 %v2827_v19 }
 0x24d   :  { %2104 = vmatpush1.bf16.msra.mxu1 %v2830_v27 }
 0x24e   :  { %2106 = vmatprep.subr.bf16.mxu1 %v2833_v31 }
 0x251   :  { %2108 = vmatpush1.bf16.msra.mxu1 %v2836_v39 }
 0x252   :  { %2110 = vmatprep.subr.bf16.mxu1 %v2839_v43 }
 0x255   :  { %2112 = vmatpush1.bf16.msra.mxu1 %v2842_v51 }
 0x256   :  { %2114 = vmatprep.subr.bf16.mxu1 %v2845_v55 }
 0x259   :  { %2116 = vmatpush1.bf16.msra.mxu1 %v2848_v63 }
 0x25a   :  { %2118 = vmatprep.subr.bf16.mxu1 %v2851_v3 }
 0x25d   :  { %2120 = vmatpush1.bf16.msra.mxu1 %v2854_v12 }
 0x25e   :  { %2122 = vmatprep.subr.bf16.mxu1 %v2857_v17 }
 0x261   :  { %2124 = vmatpush1.bf16.msra.mxu1 %v2860_v26 }
 0x262   :  { %2126 = vmatprep.subr.bf16.mxu1 %v2863_v32 }
 0x265   :  { %2128 = vmatpush1.bf16.msra.mxu1 %v2866_v41 }
 0x266   :  { %2130 = vmatprep.subr.bf16.mxu1 %v2869_v46 }
 0x269   :  { %2132 = vmatpush1.bf16.msra.mxu1 %v2872_v56 }
 0x26a   :  { %2134 = vmatprep.subr.bf16.mxu1 %v2875_v60 }
 0x26d   :  { %2136 = vmatpush1.bf16.msra.mxu1 %v2878_v6 }
 0x26e   :  { %2138 = vmatprep.subr.bf16.mxu1 %v2881_v11 }
 0x271   :  { %2140 = vmatpush1.bf16.msra.mxu1 %v2884_v23 }
 0x272   :  { %2142 = vmatprep.subr.bf16.mxu1 %v2887_v29 }
 0x275   :  { %2144 = vmatpush1.bf16.msra.mxu1 %v2890_v40 }
 0x276   :  { %2146 = vmatprep.subr.bf16.mxu1 %v2895_v49 }
 0x279   :  { %2148 = vmatpush1.bf16.msra.mxu1 %v2902_v61 }
 0x27a   :  { %2150 = vmatprep.subr.bf16.mxu1 %v2907_v5 }
 0x27d   :  { %2152 = vmatpush1.bf16.msra.mxu1 %v2914_v20 }
 0x27e   :  { %2154 = vmatprep.subr.bf16.mxu1 %v2916_v25 }
 0x281   :  { %2156 = vmatpush1.bf16.msra.mxu1 %v2920_v38 }
 0x282   :  { %2158 = vmatprep.subr.bf16.mxu1 %v2922_v47 }
 0x285   :  { %2160 = vmatpush1.bf16.msra.mxu1 %v2926_v59 }
 0x286   :  { %2162 = vmatprep.subr.bf16.mxu1 %v2821_v7 }
 0x31b   :  { %v985_v48 = vpop.f32.mrb[2].mxu1 }
 0x31c   :  { %v992_v50 = vrot.slane %v985_v48, 6  ;;  %v987_v52 = vpop.f32.mrb[3].mxu1 }
 0x31d   :  { %v993_v53 = vrot.slane %v987_v52, 6 }
 0x31e   :  { %v996_v54 = vadd.f32 %v3026_v24, %v992_v50 }
 0x31f   :  { %v997_v57 = vadd.f32 %v3028_v30, %v993_v53 }
 0x320   :  { %v998_v58 = vmax.f32 %v996_v54, 0.0 }
 0x321   :  { %v999_v62 = vmax.f32 %v997_v57, 0.0 }
 0x322   :  { %v1002_v2 = vrot.slane %v998_v58, 2  ;;  %v1511_v16 = vsel %vm1510_vm1, %v917_v45, %v998_v58 }
 0x323   :  { %v1003_v1 = vrot.slane %v999_v62, 2  ;;  %v1512_v21 = vsel %vm1510_vm1, %v918_v42, %v999_v62 }
 0x325   :  { %1070 = vmatprep.mubr.f32.mxu1 %v1003_v1 }
 0x326   :  { %1071 = vmatmul.mubr.f32.vlgmr.msra.gmra.mrb[4].mxu1 %v1002_v2 }
 0x327   :  { %2164 = vmatpush1.bf16.msra.mxu1 %v2824_v15 }
 0x328   :  { %2166 = vmatprep.subr.bf16.mxu1 %v2827_v19 }
 0x32b   :  { %2168 = vmatpush1.bf16.msra.mxu1 %v2830_v27 }
 0x32c   :  { %2170 = vmatprep.subr.bf16.mxu1 %v2833_v31 }
 0x32f   :  { %2172 = vmatpush1.bf16.msra.mxu1 %v2836_v39 }
 0x330   :  { %2174 = vmatprep.subr.bf16.mxu1 %v2839_v43 }
 0x333   :  { %2176 = vmatpush1.bf16.msra.mxu1 %v2842_v51 }
 0x334   :  { %2178 = vmatprep.subr.bf16.mxu1 %v2845_v55 }
 0x337   :  { %2180 = vmatpush1.bf16.msra.mxu1 %v2848_v63 }
 0x338   :  { %2182 = vmatprep.subr.bf16.mxu1 %v2851_v3 }
 0x33b   :  { %2184 = vmatpush1.bf16.msra.mxu1 %v2854_v12 }
 0x33c   :  { %2186 = vmatprep.subr.bf16.mxu1 %v2857_v17 }
 0x33f   :  { %2188 = vmatpush1.bf16.msra.mxu1 %v2860_v26 }
 0x340   :  { %2190 = vmatprep.subr.bf16.mxu1 %v2863_v32 }
 0x343   :  { %2192 = vmatpush1.bf16.msra.mxu1 %v2866_v41 }
 0x344   :  { %2194 = vmatprep.subr.bf16.mxu1 %v2869_v46 }
 0x347   :  { %2196 = vmatpush1.bf16.msra.mxu1 %v2872_v56 }
 0x348   :  { %2198 = vmatprep.subr.bf16.mxu1 %v2875_v60 }
 0x34b   :  { %2200 = vmatpush1.bf16.msra.mxu1 %v2878_v6 }
 0x34c   :  { %2202 = vmatprep.subr.bf16.mxu1 %v2881_v11 }
 0x34f   :  { %2204 = vmatpush1.bf16.msra.mxu1 %v2884_v23 }
 0x350   :  { %2206 = vmatprep.subr.bf16.mxu1 %v2887_v29 }
 0x353   :  { %2208 = vmatpush1.bf16.msra.mxu1 %v2890_v40 }
 0x354   :  { %2210 = vmatprep.subr.bf16.mxu1 %v2895_v49 }
 0x357   :  { %2212 = vmatpush1.bf16.msra.mxu1 %v2902_v61 }
 0x358   :  { %2214 = vmatprep.subr.bf16.mxu1 %v2907_v5 }
 0x35b   :  { %2216 = vmatpush1.bf16.msra.mxu1 %v2914_v20 }
 0x35c   :  { %2218 = vmatprep.subr.bf16.mxu1 %v2916_v25 }
 0x35f   :  { %2220 = vmatpush1.bf16.msra.mxu1 %v2920_v38 }
 0x360   :  { %2222 = vmatprep.subr.bf16.mxu1 %v2922_v47 }
 0x363   :  { %2224 = vmatpush1.bf16.msra.mxu1 %v2926_v59 }
 0x364   :  { %2226 = vmatprep.subr.bf16.mxu1 %v2821_v7 }
 0x3f9   :  { %v1072_v4 = vpop.f32.mrb[4].mxu1 }
 0x3fa   :  { %v1079_v0 = vrot.slane %v1072_v4, 4  ;;  %v1074_v8 = vpop.f32.mrb[5].mxu1 }
 0x3fb   :  { %v1080_v9 = vrot.slane %v1074_v8, 4  ;;  %v1532_v8 = vld [vmem:[#allocation8 + $0x38] sm:$0xff] }
 0x3fc   :  { %v1083_v10 = vadd.f32 %v3026_v24, %v1079_v0  ;;  %v1531_v0 = vld [vmem:[#allocation8 + $0x30] sm:$0xff] }
 0x3fd   :  { %v1084_v13 = vadd.f32 %v3028_v30, %v1080_v9  ;;  %v1549_v9 = vld [vmem:[#allocation8 + $0xc0] sm:$0xff] }
 0x3fe   :  { %v1085_v14 = vmax.f32 %v1083_v10, 0.0  ;;  %v1550_v10 = vld [vmem:[#allocation8 + $0xc8] sm:$0xff] }
 0x3ff   :  { %v1086_v18 = vmax.f32 %v1084_v13, 0.0  ;;  %v2495_v13 = vpack.c.bf16 %v1532_v8, %v1531_v0 }
 0x400   :  { %v1514_v22 = vsel %vm1513_vm2, %v1511_v16, %v1085_v14  ;;  %v1089_v37 = vrot.slane %v1085_v14, 4  ;;  %v2497_v14 = vpack.c.bf16 %v1550_v10, %v1549_v9  ;;  %v1533_v16 = vld [vmem:[#allocation8 + $0x40] sm:$0xff] }
 0x401   :  { %v1090_v28 = vrot.slane %v1086_v18, 4  ;;  %v1515_v35 = vsel %vm1513_vm2, %v1512_v21, %v1086_v18  ;;  %v1534_v18 = vld [vmem:[#allocation8 + $0x48] sm:$0xff]  ;;  %v1551_v21 = vld [vmem:[#allocation8 + $0xd0] sm:$0xff] }
 0x403   :  { %1157 = vmatprep.mubr.f32.mxu1 %v1090_v28  ;;  %v2499_v28 = vpack.c.bf16 %v1534_v18, %v1533_v16 }
 0x404   :  { %1158 = vmatmul.mubr.f32.vlgmr.msra.gmra.mrb[6].mxu1 %v1089_v37  ;;  %v1535_v37 = vld [vmem:[#allocation8 + $0x50] sm:$0xff] }
 0x405   :  { %2228 = vmatpush1.bf16.msra.mxu1 %v2824_v15 }
 0x406   :  { %2230 = vmatprep.subr.bf16.mxu1 %v2827_v19 }
 0x409   :  { %2232 = vmatpush1.bf16.msra.mxu1 %v2830_v27 }
 0x40a   :  { %2234 = vmatprep.subr.bf16.mxu1 %v2833_v31 }
 0x40d   :  { %2236 = vmatpush1.bf16.msra.mxu1 %v2836_v39 }
 0x40e   :  { %2238 = vmatprep.subr.bf16.mxu1 %v2839_v43 }
 0x411   :  { %2240 = vmatpush1.bf16.msra.mxu1 %v2842_v51 }
 0x412   :  { %2242 = vmatprep.subr.bf16.mxu1 %v2845_v55 }
 0x415   :  { %2244 = vmatpush1.bf16.msra.mxu1 %v2848_v63 }
 0x416   :  { %2246 = vmatprep.subr.bf16.mxu1 %v2851_v3 }
 0x419   :  { %2248 = vmatpush1.bf16.msra.mxu1 %v2854_v12 }
 0x41a   :  { %2250 = vmatprep.subr.bf16.mxu1 %v2857_v17 }
 0x41d   :  { %2252 = vmatpush1.bf16.msra.mxu1 %v2860_v26 }
 0x41e   :  { %2254 = vmatprep.subr.bf16.mxu1 %v2863_v32 }
 0x421   :  { %2256 = vmatpush1.bf16.msra.mxu1 %v2866_v41 }
 0x422   :  { %2258 = vmatprep.subr.bf16.mxu1 %v2869_v46 }
 0x425   :  { %2260 = vmatpush1.bf16.msra.mxu1 %v2872_v56 }
 0x426   :  { %2262 = vmatprep.subr.bf16.mxu1 %v2875_v60 }
 0x429   :  { %2264 = vmatpush1.bf16.msra.mxu1 %v2878_v6 }
 0x42a   :  { %2266 = vmatprep.subr.bf16.mxu1 %v2881_v11 }
 0x42d   :  { %2268 = vmatpush1.bf16.msra.mxu1 %v2884_v23 }
 0x42e   :  { %2270 = vmatprep.subr.bf16.mxu1 %v2887_v29 }
 0x431   :  { %2272 = vmatpush1.bf16.msra.mxu1 %v2890_v40 }
 0x432   :  { %2274 = vmatprep.subr.bf16.mxu1 %v2895_v49 }
 0x435   :  { %2276 = vmatpush1.bf16.msra.mxu1 %v2902_v61 }
 0x436   :  { %2278 = vmatprep.subr.bf16.mxu1 %v2907_v5 }
 0x439   :  { %2280 = vmatpush1.bf16.msra.mxu1 %v2914_v20 }
 0x43a   :  { %2282 = vmatprep.subr.bf16.mxu1 %v2916_v25 }
 0x43d   :  { %2284 = vmatpush1.bf16.msra.mxu1 %v2920_v38 }
 0x43e   :  { %2286 = vmatprep.subr.bf16.mxu1 %v2922_v47 }
 0x441   :  { %2288 = vmatpush1.bf16.msra.mxu1 %v2926_v59 }
 0x442   :  { %2354 = vmatprep.subr.bf16.mxu1 %v2821_v7 }
 0x4d7   :  { %v1159_v33 = vpop.f32.mrb[6].mxu1 }
 0x4d8   :  { %v1166_v34 = vrot.slane %v1159_v33, 2  ;;  %v1161_v42 = vpop.f32.mrb[7].mxu1  ;;  %v1536_v33 = vld [vmem:[#allocation8 + $0x58] sm:$0xff] }
 0x4d9   :  { %v1167_v45 = vrot.slane %v1161_v42, 2  ;;  %v1554_v42 = vld [vmem:[#allocation8 + $0xe8] sm:$0xff] }
 0x4da   :  { %v1170_v48 = vadd.f32 %v3026_v24, %v1166_v34  ;;  %v1553_v34 = vld [vmem:[#allocation8 + $0xe0] sm:$0xff] }
 0x4db   :  { %v1171_v50 = vadd.f32 %v3028_v30, %v1167_v45  ;;  %v2503_v45 = vpack.c.bf16 %v1536_v33, %v1535_v37 }
 0x4dc   :  { %v1172_v52 = vmax.f32 %v1170_v48, 0.0  ;;  %v2505_v48 = vpack.c.bf16 %v1554_v42, %v1553_v34 }
 0x4dd   :  { %v1173_v53 = vmax.f32 %v1171_v50, 0.0  ;;  %v1537_v50 = vld [vmem:[#allocation8 + $0x60] sm:$0xff] }
 0x4de   :  { %v3157_v54 = vsel %vm1516_vm3, %v1514_v22, %v1172_v52  ;;  %v1176_v62 = vrot.slane %v1172_v52, 6  ;;  %v1552_v22 = vld [vmem:[#allocation8 + $0xd8] sm:$0xff]  ;;  %v1538_v52 = vld [vmem:[#allocation8 + $0x68] sm:$0xff] }
 0x4df   :  { %v1177_v57 = vrot.slane %v1173_v53, 6  ;;  %v3160_v58 = vsel %vm1516_vm3, %v1515_v35, %v1173_v53  ;;  %v2501_v35 = vpack.c.bf16 %v1552_v22, %v1551_v21  ;;  %v1555_v53 = vld [vmem:[#allocation8 + $0xf0] sm:$0xff] }
 0x4e1   :  { %1244 = vmatprep.mubr.f32.mxu1 %v1177_v57  ;;  %v1556_v57 = vld [vmem:[#allocation8 + $0xf8] sm:$0xff] }
 0x4e2   :  { %1245 = vmatmul.mubr.f32.vlgmr.msra.gmra.mrb[8].mxu1 %v1176_v62  ;;  %v2509_v62 = vpack.c.bf16 %v1556_v57, %v1555_v53 }
 0x4e3   :  { %2356 = vmatpush1.bf16.msra.mxu1 %v2824_v15 }
 0x4e4   :  { %2358 = vmatprep.subr.bf16.mxu1 %v2827_v19 }
 0x4e7   :  { %2360 = vmatpush1.bf16.msra.mxu1 %v2830_v27 }
 0x4e8   :  { %2362 = vmatprep.subr.bf16.mxu1 %v2833_v31 }
 0x4eb   :  { %2364 = vmatpush1.bf16.msra.mxu1 %v2836_v39 }
 0x4ec   :  { %2366 = vmatprep.subr.bf16.mxu1 %v2839_v43 }
 0x4ef   :  { %2368 = vmatpush1.bf16.msra.mxu1 %v2842_v51 }
 0x4f0   :  { %2370 = vmatprep.subr.bf16.mxu1 %v2845_v55 }
 0x4f3   :  { %2372 = vmatpush1.bf16.msra.mxu1 %v2848_v63 }
 0x4f4   :  { %2374 = vmatprep.subr.bf16.mxu1 %v2851_v3 }
 0x4f7   :  { %2376 = vmatpush1.bf16.msra.mxu1 %v2854_v12 }
 0x4f8   :  { %2378 = vmatprep.subr.bf16.mxu1 %v2857_v17 }
 0x4fb   :  { %2380 = vmatpush1.bf16.msra.mxu1 %v2860_v26 }
 0x4fc   :  { %2382 = vmatprep.subr.bf16.mxu1 %v2863_v32 }
 0x4ff   :  { %2384 = vmatpush1.bf16.msra.mxu1 %v2866_v41 }
 0x500   :  { %2386 = vmatprep.subr.bf16.mxu1 %v2869_v46 }
 0x503   :  { %2388 = vmatpush1.bf16.msra.mxu1 %v2872_v56 }
 0x504   :  { %2390 = vmatprep.subr.bf16.mxu1 %v2875_v60 }
 0x507   :  { %2392 = vmatpush1.bf16.msra.mxu1 %v2878_v6 }
 0x508   :  { %2394 = vmatprep.subr.bf16.mxu1 %v2881_v11 }
 0x50b   :  { %2396 = vmatpush1.bf16.msra.mxu1 %v2884_v23 }
 0x50c   :  { %2398 = vmatprep.subr.bf16.mxu1 %v2887_v29 }
 0x50f   :  { %2400 = vmatpush1.bf16.msra.mxu1 %v2890_v40 }
 0x510   :  { %2402 = vmatprep.subr.bf16.mxu1 %v2895_v49 }
 0x513   :  { %2404 = vmatpush1.bf16.msra.mxu1 %v2902_v61 }
 0x514   :  { %2406 = vmatprep.subr.bf16.mxu1 %v2907_v5 }
 0x517   :  { %2408 = vmatpush1.bf16.msra.mxu1 %v2914_v20 }
 0x518   :  { %2410 = vmatprep.subr.bf16.mxu1 %v2916_v25 }
 0x51b   :  { %2412 = vmatpush1.bf16.msra.mxu1 %v2920_v38 }
 0x51c   :  { %2414 = vmatprep.subr.bf16.mxu1 %v2922_v47 }
 0x51f   :  { %2416 = vmatpush1.bf16.msra.mxu1 %v2926_v59 }
 0x5b5   :  { %v1246_v7 = vpop.f32.mrb[8].mxu1 }
 0x5b6   :  { %v3194_v24 = vadd.f32 %v3036_v36, %v1246_v7  ;;  %v1248_v30 = vpop.f32.mrb[9].mxu1  ;;  %v1539_v7 = vld [vmem:[#allocation8 + $0x70] sm:$0xff] }
 0x5b7   :  { %v3197_v1 = vadd.f32 %v3039_v44, %v1248_v30  ;;  %v1540_v30 = vld [vmem:[#allocation8 + $0x78] sm:$0xff] }
 0x5b8   :  { %v1253_v4 = vmax.f32 %v3194_v24, 0.0 }
 0x5b9   :  { %v1254_v2 = vmax.f32 %v3197_v1, 0.0 }
 0x5bb   :  { %1319 = vmatprep.mubr.f32.mxu0 %v1254_v2 }
 0x5bc   :  { %1320 = vmatmul.mubr.f32.vlgmr.msra.gmra.mrb[4].mxu0 %v1253_v4 }
 0x5bd   :  { %2420 = vmatpush1.bf16.msra.mxu0 %v2824_v15  ;;  %v1541_v15 = vld [vmem:[#allocation8 + $0x80] sm:$0xff] }
 0x5be   :  { %2422 = vmatprep.subr.bf16.mxu0 %v2827_v19  ;;  %v1542_v19 = vld [vmem:[#allocation8 + $0x88] sm:$0xff] }
 0x5c1   :  { %2424 = vmatpush1.bf16.msra.mxu0 %v2830_v27  ;;  %v2481_v27 = vpack.c.bf16 %v1542_v19, %v1541_v15  ;;  %v2511_v15 = vpack.c.bf16 %v1540_v30, %v1539_v7 }
 0x5c2   :  { %2426 = vmatprep.subr.bf16.mxu0 %v2833_v31 }
 0x5c3   :  { %2482 = vmatprep.subr.bf16.mxu1 %v2481_v27 }
 0x5c5   :  { %2428 = vmatpush1.bf16.msra.mxu0 %v2836_v39 }
 0x5c6   :  { %2430 = vmatprep.subr.bf16.mxu0 %v2839_v43 }
 0x5c9   :  { %2432 = vmatpush1.bf16.msra.mxu0 %v2842_v51 }
 0x5ca   :  { %2434 = vmatprep.subr.bf16.mxu0 %v2845_v55 }
 0x5cd   :  { %2436 = vmatpush1.bf16.msra.mxu0 %v2848_v63 }
 0x5ce   :  { %2438 = vmatprep.subr.bf16.mxu0 %v2851_v3 }
 0x5d1   :  { %2440 = vmatpush1.bf16.msra.mxu0 %v2854_v12  ;;  %v1525_v12 = vld [vmem:[#allocation8] sm:$0xff] }
 0x5d2   :  { %2442 = vmatprep.subr.bf16.mxu0 %v2857_v17  ;;  %v1526_v17 = vld [vmem:[#allocation8 + $0x8] sm:$0xff] }
 0x5d5   :  { %2444 = vmatpush1.bf16.msra.mxu0 %v2860_v26 }
 0x5d6   :  { %2446 = vmatprep.subr.bf16.mxu0 %v2863_v32  ;;  %v1543_v32 = vld [vmem:[#allocation8 + $0x90] sm:$0xff] }
 0x5d9   :  { %2448 = vmatpush1.bf16.msra.mxu0 %v2866_v41  ;;  %v1544_v41 = vld [vmem:[#allocation8 + $0x98] sm:$0xff] }
 0x5da   :  { %2450 = vmatprep.subr.bf16.mxu0 %v2869_v46 }
 0x5dd   :  { %2452 = vmatpush1.bf16.msra.mxu0 %v2872_v56  ;;  %v2483_v56 = vpack.c.bf16 %v1526_v17, %v1525_v12 }
 0x5de   :  { %2454 = vmatprep.subr.bf16.mxu0 %v2875_v60 }
 0x5e1   :  { %2456 = vmatpush1.bf16.msra.mxu0 %v2878_v6  ;;  %v2485_v6 = vpack.c.bf16 %v1544_v41, %v1543_v32 }
 0x5e2   :  { %2458 = vmatprep.subr.bf16.mxu0 %v2881_v11  ;;  %v1527_v11 = vld [vmem:[#allocation8 + $0x10] sm:$0xff] }
 0x5e5   :  { %2460 = vmatpush1.bf16.msra.mxu0 %v2884_v23  ;;  %v1528_v23 = vld [vmem:[#allocation8 + $0x18] sm:$0xff] }
 0x5e6   :  { %2462 = vmatprep.subr.bf16.mxu0 %v2887_v29  ;;  %v1545_v29 = vld [vmem:[#allocation8 + $0xa0] sm:$0xff] }
 0x5e9   :  { %2464 = vmatpush1.bf16.msra.mxu0 %v2890_v40  ;;  %v1546_v40 = vld [vmem:[#allocation8 + $0xa8] sm:$0xff] }
 0x5ea   :  { %2466 = vmatprep.subr.bf16.mxu0 %v2895_v49  ;;  %v2487_v49 = vpack.c.bf16 %v1528_v23, %v1527_v11 }
 0x5ed   :  { %2468 = vmatpush1.bf16.msra.mxu0 %v2902_v61  ;;  %v2489_v61 = vpack.c.bf16 %v1546_v40, %v1545_v29 }
 0x5ee   :  { %2470 = vmatprep.subr.bf16.mxu0 %v2907_v5  ;;  %v1529_v5 = vld [vmem:[#allocation8 + $0x20] sm:$0xff] }
 0x5f1   :  { %2472 = vmatpush1.bf16.msra.mxu0 %v2914_v20  ;;  %v1530_v20 = vld [vmem:[#allocation8 + $0x28] sm:$0xff] }
 0x5f2   :  { %2474 = vmatprep.subr.bf16.mxu0 %v2916_v25  ;;  %v1547_v25 = vld [vmem:[#allocation8 + $0xb0] sm:$0xff] }
 0x5f5   :  { %2476 = vmatpush1.bf16.msra.mxu0 %v2920_v38  ;;  %v1548_v38 = vld [vmem:[#allocation8 + $0xb8] sm:$0xff] }
 0x5f6   :  { %2478 = vmatprep.subr.bf16.mxu0 %v2922_v47  ;;  %v2491_v47 = vpack.c.bf16 %v1530_v20, %v1529_v5 }
 0x5f9   :  { %2480 = vmatpush1.bf16.msra.mxu0 %v2926_v59  ;;  %v2493_v59 = vpack.c.bf16 %v1548_v38, %v1547_v25 }
 0x68f   :  { %v1321_v31 = vpop.f32.mrb[4].mxu0 }
 0x690   :  { %v1328_v39 = vrot.slane %v1321_v31, 6  ;;  %v1323_v43 = vpop.f32.mrb[5].mxu0 }
 0x691   :  { %v1329_v51 = vrot.slane %v1323_v43, 6 }
 0x692   :  { %v3237_v55 = vadd.f32 %v3036_v36, %v1328_v39 }
 0x693   :  { %v3240_v63 = vadd.f32 %v3039_v44, %v1329_v51 }
 0x694   :  { %v1334_v3 = vmax.f32 %v3237_v55, 0.0  ;;  %v1662_v55 = vld [vmem:[#allocation10] ss:$0 sm:$0xff] }
 0x695   :  { %v1335_v26 = vmax.f32 %v3240_v63, 0.0 }
 0x696   :  { %v1338_v60 = vrot.slane %v1334_v3, 2  ;;  %v1519_v32 = vsel %vm1510_vm1, %v1253_v4, %v1334_v3 }
 0x697   :  { %v1339_v46 = vrot.slane %v1335_v26, 2 }
 0x699   :  { %1406 = vmatprep.mubr.f32.mxu1 %v1339_v46 }
 0x69a   :  { %1407 = vmatmul.mubr.f32.vlgmr.msra.gmra.mrb[10].mxu1 %v1338_v60 }
 0x69b   :  { %2484 = vmatpush3.bf16.msra.mxu1 %v2483_v56  ;;  %1628 = vmatprep.mubr.f32.mxu1 %v3160_v58  ;;  %v2507_v58 = vpack.c.bf16 %v1538_v52, %v1537_v50 }
 0x69c   :  { %2486 = vmatprep.subr.bf16.mxu1 %v2485_v6 }
 0x69f   :  { %2488 = vmatpush3.bf16.msra.mxu1 %v2487_v49 }
 0x6a0   :  { %2490 = vmatprep.subr.bf16.mxu1 %v2489_v61 }
 0x6a3   :  { %2492 = vmatpush3.bf16.msra.mxu1 %v2491_v47 }
 0x6a4   :  { %2494 = vmatprep.subr.bf16.mxu1 %v2493_v59 }
 0x6a7   :  { %2496 = vmatpush3.bf16.msra.mxu1 %v2495_v13 }
 0x6a8   :  { %2498 = vmatprep.subr.bf16.mxu1 %v2497_v14 }
 0x6ab   :  { %2500 = vmatpush3.bf16.msra.mxu1 %v2499_v28 }
 0x6ac   :  { %2502 = vmatprep.subr.bf16.mxu1 %v2501_v35 }
 0x6af   :  { %2504 = vmatpush3.bf16.msra.mxu1 %v2503_v45 }
 0x6b0   :  { %2506 = vmatprep.subr.bf16.mxu1 %v2505_v48 }
 0x6b3   :  { %2508 = vmatpush3.bf16.msra.mxu1 %v2507_v58 }
 0x6b4   :  { %2510 = vmatprep.subr.bf16.mxu1 %v2509_v62 }
 0x6b7   :  { %2512 = vmatpush3.bf16.msra.mxu1 %v2511_v15 }
 0x6ba   :  { %1629 = vmatmul.mubr.f32.vlgmr.msra.gmra.mrb[12].mxu1 %v3157_v54  ;;  %v1520_v54 = vsel %vm1510_vm1, %v1254_v2, %v1335_v26 }
 0x76d   :  { %v1408_v19 = vpop.f32.mrb[10].mxu1 }
 0x76e   :  { %v1415_v27 = vrot.slane %v1408_v19, 4  ;;  %v1410_v31 = vpop.f32.mrb[11].mxu1 }
 0x76f   :  { %v1416_v39 = vrot.slane %v1410_v31, 4 }
 0x770   :  { %v1419_v43 = vadd.f32 %v3036_v36, %v1415_v27 }
 0x771   :  { %v1420_v51 = vadd.f32 %v3039_v44, %v1416_v39 }
 0x772   :  { %v1421_v12 = vmax.f32 %v1419_v43, 0.0 }
 0x773   :  { %v1422_v17 = vmax.f32 %v1420_v51, 0.0 }
 0x774   :  { %v1521_v41 = vsel %vm1513_vm2, %v1519_v32, %v1421_v12  ;;  %v1425_v60 = vrot.slane %v1421_v12, 4 }
 0x775   :  { %v1426_v46 = vrot.slane %v1422_v17, 4  ;;  %v1522_v56 = vsel %vm1513_vm2, %v1520_v54, %v1422_v17 }
 0x777   :  { %1493 = vmatprep.mubr.f32.mxu0 %v1426_v46 }
 0x778   :  { %1494 = vmatmul.mubr.f32.vlgmr.msra.gmra.mrb[6].mxu0 %v1425_v60 }
 0x78d   :  { %v1695_v6 = vpop.f32.mrb[12].mxu1 }
 0x78e   :  { %v1696_v11 = vpop.f32.mrb[13].mxu1 }
 0x78f   :  { %v1697_v24 = vadd.f32 %v1696_v11, %v1695_v6 }
 0x791   :  { %v1631_v23 = vadd.f32 %v1697_v24, %v1662_v55 }
 0x793   :  { %1639 = vst [vmem:[#allocation11] sm:$0xff] %v1631_v23 }
 0x84b   :  { %v1495_v4 = vpop.f32.mrb[6].mxu0 }
 0x84c   :  { %v1502_v63 = vrot.slane %v1495_v4, 2  ;;  %v1497_v3 = vpop.f32.mrb[7].mxu0 }
 0x84d   :  { %v1503_v1 = vrot.slane %v1497_v3, 2 }
 0x84e   :  { %v1506_v2 = vadd.f32 %v3036_v36, %v1502_v63 }
 0x84f   :  { %v1507_v26 = vadd.f32 %v3039_v44, %v1503_v1 }
 0x850   :  { %v1508_v29 = vmax.f32 %v1506_v2, 0.0 }
 0x851   :  { %v1509_v40 = vmax.f32 %v1507_v26, 0.0 }
 0x852   :  { %v1523_v49 = vsel %vm1516_vm3, %v1521_v41, %v1508_v29 }
 0x853   :  { %v1524_v61 = vsel %vm1516_vm3, %v1522_v56, %v1509_v40 }
 0x854   :  { %1633 = vmatprep.mubr.f32.mxu1 %v1524_v61 }
 0x855   :  { %1634 = vmatmul.mubr.f32.gmra.mrb[14].mxu1 %v1523_v49 }
 0x928   :  { %v1698_v5 = vpop.f32.mrb[14].mxu1 }
 0x929   :  { %v1699_v20 = vpop.f32.mrb[15].mxu1 }
 0x92a   :  { %v1700_v25 = vadd.f32 %v1699_v20, %v1698_v5 }
 0x92c   :  { %v1636_v38 = vadd.f32 %v1700_v25, %v1662_v55 }
 0x92e   :  { %1640 = vst [vmem:[#allocation11 + $0x8] sm:$0xff] %v1636_v38 }
 0x92f   :  { %2665 = shalt.err (!%p2662_p2)
}
 0x930   :  { %s2666_s9 = scalar_lea.hbm %s3289_s6, 256 }
 0x931   :  { %p2667_p3 = scmp.ne.s32.totalorder %s3289_s6, %s2666_s9  ;;  %p2670_p4 = scmp.lt.u32.totalorder %s2666_s9, %s3289_s6 }
 0x933   :  { %p2672_p5 = pnand %p2670_p4, %p2667_p3 }
 0x935   :  { %2675 = shalt.err (!%p2672_p5)
}
 0x936   :  { %1652 = dma.vmem_to_hbm [thread:$0]  %s1647_s20, 256, %s3289_s6, [#allocation4], %s2688_s2, %s2688_s2, %s2689_s21  }
 0x937   :  { %2682 = dma.done.wait [#allocation4], 256  }
 0x938   :  { %2683 = vsyncadd [#allocation4], 4294967040 }
 0x939   :  { %1656 = vsyncpa [#allocation3], 1 }
 0x93a   :  { %1657 = vsyncpa [#allocation6], 1 }
 0x93b   :  { %1658 = vsyncpa [#allocation9], 1 }
 0x93c   :  { %1659 = vsyncpa [#allocation4], 1 }

</bundles_post_ra>
